<compile_context>
chip_gen: v7x
topology: tpu7x:2x2x1
jax: 0.10.0
libtpu: 0.0.40
codegen_flags: <defaults>
</compile_context>

<pallas_src>
import jax
import jax.numpy as jnp
from jax.experimental import pallas as pl
from jax.experimental.pallas import tpu as pltpu


LAMBDA_COORD = 5.0
LAMBDA_NOOBJ = 0.5
NUM_CLASSES = 10
NUM_FEATS = 15  # conf, x, y, w, h, c0..c9  (num_anchors == 1)


def _round_up(x, m):
    return -(-x // m) * m


def _make_yolo_kernel(n_cols, l_blk, h):
    """Kernel over one (15, H, l_blk) channel-planar block of lane columns."""

    def kernel(x_ref, t_ref, out_ref):
        # x_ref, t_ref: (15, H, L) raw predictions / targets; lanes = flattened
        # (batch, W) columns.  out_ref: (1, 8) f32 SMEM row of partial sums:
        #   [box_sum, conf_sum, noobj_sum, noobj_cnt, cls_sum, 0, 0, 0]
        x = x_ref[...].astype(jnp.float32)
        t = t_ref[...].astype(jnp.float32)
        L = x.shape[2]

        # Mask for the (possibly padded) last block: only columns < B*W count.
        col = (jax.lax.broadcasted_iota(jnp.int32, (1, 1, L), 2)
               + pl.program_id(0) * l_blk)
        valid = col < n_cols                                    # (1, 1, L)

        # ---- confidence / box terms (leading-axis channel slices: free) ------
        pred_conf = jax.nn.sigmoid(x[0:1])                      # (1, H, L)
        pred_box = jax.nn.sigmoid(x[1:5])                       # (4, H, L)
        dconf = pred_conf - t[0:1]
        dbox = pred_box - t[1:5]
        conf_sq = dconf * dconf

        box_sum = jnp.sum(jnp.where(valid, dbox * dbox, 0.0))
        conf_sum = jnp.sum(jnp.where(valid, conf_sq, 0.0))

        # Under the no-object mask true_conf == 0, so dconf == pred_conf: reuse conf_sq.
        noobj_mask = jnp.logical_and(t[0:1] == 0.0, valid)      # (1, H, L)
        noobj_sum = jnp.sum(jnp.where(noobj_mask, conf_sq, 0.0))
        noobj_cnt = jnp.sum(noobj_mask.astype(jnp.float32))

        # ---- class loss ------------------------------------------------------
        logits = x[5:15]                                        # (10, H, L)
        tcls = t[5:15]

        # Per-cell softmax over the 10 classes: cross-vreg VPU reduce over the
        # leading class axis; exact normalization (no approx reciprocal).
        m = jnp.max(logits, axis=0, keepdims=True)
        e = jnp.exp(logits - m)
        p = e / jnp.sum(e, axis=0, keepdims=True)               # (10, H, L)

        # The module's F.cross_entropy on the NHWC tensor treats dim=1 (H) as the
        # class axis: -log_softmax over H of the already-softmaxed scores, taken
        # at the first-index argmax over H of the target class scores.  p is in
        # [0, 1], so the log-sum-exp over H needs no max shift.
        q = jnp.exp(p)                                          # (10, H, L)
        lse = jnp.log(jnp.sum(q, axis=1, keepdims=True))        # (10, 1, L)

        iota_h = jax.lax.broadcasted_iota(jnp.int32, tcls.shape, 1)
        tmax = jnp.max(tcls, axis=1, keepdims=True)
        idx = jnp.min(jnp.where(tcls == tmax, iota_h, h), axis=1, keepdims=True)
        picked = jnp.sum(jnp.where(iota_h == idx, p, 0.0), axis=1, keepdims=True)

        cls_sum = jnp.sum(jnp.where(valid, lse - picked, 0.0))  # sum over (10, L)

        out_ref[0, 0] = box_sum
        out_ref[0, 1] = conf_sum
        out_ref[0, 2] = noobj_sum
        out_ref[0, 3] = noobj_cnt
        out_ref[0, 4] = cls_sum
        out_ref[0, 5] = jnp.float32(0.0)
        out_ref[0, 6] = jnp.float32(0.0)
        out_ref[0, 7] = jnp.float32(0.0)

    return kernel


def _pick_lane_block(n_cols, h, itemsize):
    """Pick a lane-block size (multiple of 128, or the full extent) plus an
    explicit scoped-VMEM limit, counting in-kernel f32 intermediates."""
    try:
        vmem_cap = int(pltpu.get_tpu_info().vmem_capacity_bytes)
    except Exception:
        vmem_cap = 64 << 20  # conservative (v7x-sized) fallback

    # Per-lane-column footprint of one block:
    #  * inputs: 2 tensors x 15 channels x H rows, double-buffered by the pipeline
    #    (H padded to the dtype's sublane tile: 8 rows f32, 16 rows bf16).
    #  * temps : f32 upcasts of x/t (30 planes) plus exp / softmax / diff / mask
    #    temporaries -- budgeted at ~96 H-rows of f32 per column.
    sub = 8 if itemsize >= 4 else (16 if itemsize == 2 else 32)
    per_col = (2 * NUM_FEATS * _round_up(h, sub) * itemsize * 2
               + 96 * _round_up(h, 8) * 4)

    budget = min(max(vmem_cap // 4, 8 << 20), 32 << 20)
    fit = max(128, (budget // per_col) // 128 * 128)

    if n_cols <= 512:
        l_blk = n_cols  # tiny problem: one full-extent block
    else:
        # Aim for >=4 blocks (v7x has 2 TensorCores) while keeping blocks >=512
        # lanes (amortize the ~0.35us/step overhead on v5e/v6e) and within the
        # VMEM budget.
        quarter = _round_up(-(-n_cols // 4), 128)
        l_blk = min(fit, max(512, quarter))
        l_blk = min(l_blk, _round_up(n_cols, 128))

    vmem_limit = int(min(vmem_cap * 3 // 4, 96 << 20,
                         max(32 << 20, 2 * per_col * l_blk)))
    return l_blk, vmem_limit


def yolo_loss_pallas(output, target):
    """output, target: (B, H, W, 15) as in the PyTorch module.
    Returns (total_loss, (box_loss, obj_loss, noobj_loss, cls_loss))."""
    B, H, W, C = output.shape
    assert C == NUM_FEATS, "expected 15 * num_anchors channels with num_anchors == 1"
    assert target.shape == output.shape
    n_cols = B * W

    # One-time relayout to channel-planar (15, H, B*W): channels lead, H on
    # sublanes, flattened (batch, W) columns dense on the 128-lane axis.
    xp = jnp.transpose(output, (3, 1, 0, 2)).reshape(NUM_FEATS, H, n_cols)
    tp = jnp.transpose(target, (3, 1, 0, 2)).reshape(NUM_FEATS, H, n_cols)

    itemsize = jnp.dtype(output.dtype).itemsize
    l_blk, vmem_limit = _pick_lane_block(n_cols, H, itemsize)
    num_blocks = -(-n_cols // l_blk)

    partials = pl.pallas_call(
        _make_yolo_kernel(n_cols, l_blk, H),
        out_shape=jax.ShapeDtypeStruct((num_blocks, 8), jnp.float32),
        grid=(num_blocks,),
        in_specs=[
            pl.BlockSpec((NUM_FEATS, H, l_blk), lambda b: (0, 0, b)),
            pl.BlockSpec((NUM_FEATS, H, l_blk), lambda b: (0, 0, b)),
        ],
        out_specs=pl.BlockSpec((1, 8), lambda b: (b, 0),
                               memory_space=pltpu.MemorySpace.SMEM),
        compiler_params=pltpu.CompilerParams(
            dimension_semantics=("parallel",),
            vmem_limit_bytes=vmem_limit),
    )(xp, tp)

    # 8-scalar finalization (glue): reduce the per-block partials, apply means
    # and lambdas.
    s = jnp.sum(partials, axis=0)
    n_cells = float(B * H * W)
    box_loss = LAMBDA_COORD * s[0] / (n_cells * 4.0)
    obj_loss = s[1] / n_cells
    # Dividing by the raw no-object count keeps PyTorch's NaN-on-empty-mask
    # semantics (mean over an empty selection).
    noobj_loss = LAMBDA_NOOBJ * s[2] / s[3]
    cls_loss = s[4] / float(B * W * NUM_CLASSES)
    total = box_loss + obj_loss + noobj_loss + cls_loss
    return total, (box_loss, obj_loss, noobj_loss, cls_loss)


def yolo_loss_ref(output, target):
    """Pure-JAX reference mirroring the PyTorch forward exactly."""
    pred_conf = jax.nn.sigmoid(output[..., 0:1])
    pred_boxes = jax.nn.sigmoid(output[..., 1:5])
    pred_cls = jax.nn.softmax(output[..., 5:15], axis=-1)
    true_conf = target[..., 0:1]
    true_boxes = target[..., 1:5]
    true_cls = target[..., 5:15]

    box_loss = LAMBDA_COORD * jnp.mean((pred_boxes - true_boxes) ** 2)
    obj_loss = jnp.mean((pred_conf - true_conf) ** 2)
    mask = true_conf == 0.0
    noobj_loss = LAMBDA_NOOBJ * jnp.sum(jnp.where(mask, pred_conf**2, 0.0)) / jnp.sum(mask)
    # F.cross_entropy with a 4D input treats dim=1 (H) as the class dimension.
    logz = jax.nn.log_softmax(pred_cls, axis=1)              # (B, H, W, 10)
    idx = jnp.argmax(true_cls, axis=1)                       # (B, W, 10)
    picked = jnp.take_along_axis(logz, idx[:, None, :, :], axis=1)[:, 0]
    cls_loss = -jnp.mean(picked)
    total = box_loss + obj_loss + noobj_loss + cls_loss
    return total, (box_loss, obj_loss, noobj_loss, cls_loss)


if __name__ == "__main__":
    B, H, W = 2, 16, 16
    key = jax.random.PRNGKey(0)
    k_out, k_conf, k_box, k_cls = jax.random.split(key, 4)

    # "output" = raw network logits.
    output = jax.random.normal(k_out, (B, H, W, NUM_FEATS), dtype=jnp.float32)

    # "target": conf in {0,1} (so the noobj mask is non-empty), boxes in [0,1],
    # class scores uniform (argmax picks a pseudo-label).
    t_conf = jax.random.bernoulli(k_conf, 0.3, (B, H, W, 1)).astype(jnp.float32)
    t_box = jax.random.uniform(k_box, (B, H, W, 4), dtype=jnp.float32)
    t_cls = jax.random.uniform(k_cls, (B, H, W, NUM_CLASSES), dtype=jnp.float32)
    target = jnp.concatenate([t_conf, t_box, t_cls], axis=-1)

    total, parts = yolo_loss_pallas(output, target)
    total = jax.block_until_ready(total)

    ref_total, ref_parts = yolo_loss_ref(output, target)
    ref_total = jax.block_until_ready(ref_total)

    # Exact softmax normalization now; remaining differences are f32
    # reduction-order noise.
    assert jnp.allclose(total, ref_total, rtol=1e-4, atol=1e-6), (total, ref_total)
    for got, want in zip(parts, ref_parts):
        assert jnp.allclose(got, want, rtol=1e-4, atol=1e-6), (got, want)

    print("KERNEL_OK")
</pallas_src>

<mosaic_0001>
module attributes {stable_mosaic.version = 11 : i64} {
  func.func @kernel(%arg0: i32, %arg1: memref<15x16x32xf32, #tpu.memory_space<vmem>>, %arg2: memref<15x16x32xf32, #tpu.memory_space<vmem>>, %arg3: memref<1x8xf32, #tpu.memory_space<smem>>) attributes {dimension_semantics = [#tpu.dimension_semantics<parallel>], iteration_bounds = array<i64: 1>, scalar_prefetch = 0 : i64, scratch_operands = 0 : i64, tpu.core_type = #tpu.core_type<tc>, window_params = [{transform_indices = @transform_0, window_bounds = array<i64: 15, 16, 32>}, {transform_indices = @transform_1, window_bounds = array<i64: 15, 16, 32>}, {transform_indices = @transform_2, window_bounds = array<i64: 1, 8>}]} {
    %c0 = arith.constant 0 : index
    %c0_0 = arith.constant 0 : index
    %c0_1 = arith.constant 0 : index
    %0 = vector.load %arg1[%c0, %c0_0, %c0_1] : memref<15x16x32xf32, #tpu.memory_space<vmem>>, vector<15x16x32xf32>
    %c0_2 = arith.constant 0 : index
    %c0_3 = arith.constant 0 : index
    %c0_4 = arith.constant 0 : index
    %1 = vector.load %arg2[%c0_2, %c0_3, %c0_4] : memref<15x16x32xf32, #tpu.memory_space<vmem>>, vector<15x16x32xf32>
    %2 = tpu.iota {dimensions = array<i32: 2>} : vector<1x1x32xi32>
    %c32_i32 = arith.constant 32 : i32
    %3 = arith.muli %arg0, %c32_i32 : i32
    %4 = vector.broadcast %3 : i32 to vector<1x1x32xi32>
    %5 = arith.addi %2, %4 : vector<1x1x32xi32>
    %c32_i32_5 = arith.constant 32 : i32
    %6 = vector.broadcast %c32_i32_5 : i32 to vector<1x1x32xi32>
    %7 = arith.cmpi slt, %5, %6 : vector<1x1x32xi32>
    %8 = vector.extract_strided_slice %0 {offsets = [0, 0, 0], sizes = [1, 16, 32], strides = [1, 1, 1]} : vector<15x16x32xf32> to vector<1x16x32xf32>
    %9 = arith.negf %8 : vector<1x16x32xf32>
    %10 = math.exp %9 : vector<1x16x32xf32>
    %cst = arith.constant 1.000000e+00 : f32
    %11 = vector.broadcast %cst : f32 to vector<1x16x32xf32>
    %12 = arith.addf %11, %10 : vector<1x16x32xf32>
    %13 = arith.divf %11, %12 : vector<1x16x32xf32>
    %14 = vector.extract_strided_slice %0 {offsets = [1, 0, 0], sizes = [4, 16, 32], strides = [1, 1, 1]} : vector<15x16x32xf32> to vector<4x16x32xf32>
    %15 = arith.negf %14 : vector<4x16x32xf32>
    %16 = math.exp %15 : vector<4x16x32xf32>
    %cst_6 = arith.constant 1.000000e+00 : f32
    %17 = vector.broadcast %cst_6 : f32 to vector<4x16x32xf32>
    %18 = arith.addf %17, %16 : vector<4x16x32xf32>
    %19 = arith.divf %17, %18 : vector<4x16x32xf32>
    %20 = vector.extract_strided_slice %1 {offsets = [0, 0, 0], sizes = [1, 16, 32], strides = [1, 1, 1]} : vector<15x16x32xf32> to vector<1x16x32xf32>
    %21 = arith.subf %13, %20 : vector<1x16x32xf32>
    %22 = vector.extract_strided_slice %1 {offsets = [1, 0, 0], sizes = [4, 16, 32], strides = [1, 1, 1]} : vector<15x16x32xf32> to vector<4x16x32xf32>
    %23 = arith.subf %19, %22 : vector<4x16x32xf32>
    %24 = arith.mulf %21, %21 : vector<1x16x32xf32>
    %25 = arith.mulf %23, %23 : vector<4x16x32xf32>
    %cst_7 = arith.constant 0.000000e+00 : f32
    %26 = vector.shape_cast %7 : vector<1x1x32xi1> to vector<1x1x32xi1>
    %27 = vector.broadcast %26 : vector<1x1x32xi1> to vector<4x16x32xi1>
    %28 = vector.broadcast %cst_7 : f32 to vector<4x16x32xf32>
    %29 = arith.select %27, %25, %28 : vector<4x16x32xi1>, vector<4x16x32xf32>
    %30 = vector.shape_cast %29 : vector<4x16x32xf32> to vector<1x4x16x32xf32>
    %cst_8 = arith.constant dense<0.000000e+00> : vector<1xf32>
    %31 = vector.multi_reduction <add>, %30, %cst_8 [1, 2, 3] : vector<1x4x16x32xf32> to vector<1xf32>
    %32 = vector.shape_cast %31 : vector<1xf32> to vector<1x1x1x1xf32>
    %33 = vector.extract %32[0, 0, 0, 0] : f32 from vector<1x1x1x1xf32>
    %cst_9 = arith.constant 0.000000e+00 : f32
    %34 = vector.shape_cast %7 : vector<1x1x32xi1> to vector<1x1x32xi1>
    %35 = vector.broadcast %34 : vector<1x1x32xi1> to vector<1x16x32xi1>
    %36 = vector.broadcast %cst_9 : f32 to vector<1x16x32xf32>
    %37 = arith.select %35, %24, %36 : vector<1x16x32xi1>, vector<1x16x32xf32>
    %38 = vector.shape_cast %37 : vector<1x16x32xf32> to vector<1x1x16x32xf32>
    %cst_10 = arith.constant dense<0.000000e+00> : vector<1xf32>
    %39 = vector.multi_reduction <add>, %38, %cst_10 [1, 2, 3] : vector<1x1x16x32xf32> to vector<1xf32>
    %40 = vector.shape_cast %39 : vector<1xf32> to vector<1x1x1x1xf32>
    %41 = vector.extract %40[0, 0, 0, 0] : f32 from vector<1x1x1x1xf32>
    %42 = vector.extract_strided_slice %1 {offsets = [0, 0, 0], sizes = [1, 16, 32], strides = [1, 1, 1]} : vector<15x16x32xf32> to vector<1x16x32xf32>
    %cst_11 = arith.constant 0.000000e+00 : f32
    %43 = vector.broadcast %cst_11 : f32 to vector<1x16x32xf32>
    %44 = arith.cmpf oeq, %42, %43 : vector<1x16x32xf32>
    %45 = vector.broadcast %7 : vector<1x1x32xi1> to vector<1x16x32xi1>
    %46 = arith.andi %44, %45 : vector<1x16x32xi1>
    %cst_12 = arith.constant 0.000000e+00 : f32
    %47 = vector.broadcast %cst_12 : f32 to vector<1x16x32xf32>
    %48 = arith.select %46, %24, %47 : vector<1x16x32xi1>, vector<1x16x32xf32>
    %49 = vector.shape_cast %48 : vector<1x16x32xf32> to vector<1x1x16x32xf32>
    %cst_13 = arith.constant dense<0.000000e+00> : vector<1xf32>
    %50 = vector.multi_reduction <add>, %49, %cst_13 [1, 2, 3] : vector<1x1x16x32xf32> to vector<1xf32>
    %51 = vector.shape_cast %50 : vector<1xf32> to vector<1x1x1x1xf32>
    %52 = vector.extract %51[0, 0, 0, 0] : f32 from vector<1x1x1x1xf32>
    %53 = arith.extui %46 : vector<1x16x32xi1> to vector<1x16x32xi32>
    %54 = arith.sitofp %53 : vector<1x16x32xi32> to vector<1x16x32xf32>
    %55 = vector.shape_cast %54 : vector<1x16x32xf32> to vector<1x1x16x32xf32>
    %cst_14 = arith.constant dense<0.000000e+00> : vector<1xf32>
    %56 = vector.multi_reduction <add>, %55, %cst_14 [1, 2, 3] : vector<1x1x16x32xf32> to vector<1xf32>
    %57 = vector.shape_cast %56 : vector<1xf32> to vector<1x1x1x1xf32>
    %58 = vector.extract %57[0, 0, 0, 0] : f32 from vector<1x1x1x1xf32>
    %59 = vector.extract_strided_slice %0 {offsets = [5, 0, 0], sizes = [10, 16, 32], strides = [1, 1, 1]} : vector<15x16x32xf32> to vector<10x16x32xf32>
    %60 = vector.extract_strided_slice %1 {offsets = [5, 0, 0], sizes = [10, 16, 32], strides = [1, 1, 1]} : vector<15x16x32xf32> to vector<10x16x32xf32>
    %cst_15 = arith.constant dense<0xFF800000> : vector<16x32xf32>
    %61 = vector.multi_reduction <maximumf>, %59, %cst_15 [0] : vector<10x16x32xf32> to vector<16x32xf32>
    %62 = vector.shape_cast %61 : vector<16x32xf32> to vector<1x16x32xf32>
    %63 = vector.broadcast %62 : vector<1x16x32xf32> to vector<10x16x32xf32>
    %64 = arith.subf %59, %63 : vector<10x16x32xf32>
    %65 = math.exp %64 : vector<10x16x32xf32>
    %cst_16 = arith.constant dense<0.000000e+00> : vector<16x32xf32>
    %66 = vector.multi_reduction <add>, %65, %cst_16 [0] : vector<10x16x32xf32> to vector<16x32xf32>
    %67 = vector.shape_cast %66 : vector<16x32xf32> to vector<1x16x32xf32>
    %68 = vector.broadcast %67 : vector<1x16x32xf32> to vector<10x16x32xf32>
    %69 = arith.divf %65, %68 : vector<10x16x32xf32>
    %70 = math.exp %69 : vector<10x16x32xf32>
    %cst_17 = arith.constant dense<0.000000e+00> : vector<10x32xf32>
    %71 = vector.multi_reduction <add>, %70, %cst_17 [1] : vector<10x16x32xf32> to vector<10x32xf32>
    %72 = vector.shape_cast %71 : vector<10x32xf32> to vector<10x1x32xf32>
    %73 = math.log %72 : vector<10x1x32xf32>
    %74 = tpu.iota {dimensions = array<i32: 1>} : vector<10x16x32xi32>
    %cst_18 = arith.constant dense<0xFF800000> : vector<10x32xf32>
    %75 = vector.multi_reduction <maximumf>, %60, %cst_18 [1] : vector<10x16x32xf32> to vector<10x32xf32>
    %76 = vector.shape_cast %75 : vector<10x32xf32> to vector<10x1x32xf32>
    %77 = vector.broadcast %76 : vector<10x1x32xf32> to vector<10x16x32xf32>
    %78 = arith.cmpf oeq, %60, %77 : vector<10x16x32xf32>
    %c16_i32 = arith.constant 16 : i32
    %79 = vector.broadcast %c16_i32 : i32 to vector<10x16x32xi32>
    %80 = arith.select %78, %74, %79 : vector<10x16x32xi1>, vector<10x16x32xi32>
    %cst_19 = arith.constant dense<2147483647> : vector<10x32xi32>
    %81 = vector.multi_reduction <minsi>, %80, %cst_19 [1] : vector<10x16x32xi32> to vector<10x32xi32>
    %82 = vector.shape_cast %81 : vector<10x32xi32> to vector<10x1x32xi32>
    %83 = vector.broadcast %82 : vector<10x1x32xi32> to vector<10x16x32xi32>
    %84 = arith.cmpi eq, %74, %83 : vector<10x16x32xi32>
    %cst_20 = arith.constant 0.000000e+00 : f32
    %85 = vector.broadcast %cst_20 : f32 to vector<10x16x32xf32>
    %86 = arith.select %84, %69, %85 : vector<10x16x32xi1>, vector<10x16x32xf32>
    %cst_21 = arith.constant dense<0.000000e+00> : vector<10x32xf32>
    %87 = vector.multi_reduction <add>, %86, %cst_21 [1] : vector<10x16x32xf32> to vector<10x32xf32>
    %88 = vector.shape_cast %87 : vector<10x32xf32> to vector<10x1x32xf32>
    %89 = arith.subf %73, %88 : vector<10x1x32xf32>
    %cst_22 = arith.constant 0.000000e+00 : f32
    %90 = vector.shape_cast %7 : vector<1x1x32xi1> to vector<1x1x32xi1>
    %91 = vector.broadcast %90 : vector<1x1x32xi1> to vector<10x1x32xi1>
    %92 = vector.broadcast %cst_22 : f32 to vector<10x1x32xf32>
    %93 = arith.select %91, %89, %92 : vector<10x1x32xi1>, vector<10x1x32xf32>
    %94 = vector.shape_cast %93 : vector<10x1x32xf32> to vector<1x10x1x32xf32>
    %cst_23 = arith.constant dense<0.000000e+00> : vector<1xf32>
    %95 = vector.multi_reduction <add>, %94, %cst_23 [1, 2, 3] : vector<1x10x1x32xf32> to vector<1xf32>
    %96 = vector.shape_cast %95 : vector<1xf32> to vector<1x1x1x1xf32>
    %97 = vector.extract %96[0, 0, 0, 0] : f32 from vector<1x1x1x1xf32>
    %c0_24 = arith.constant 0 : index
    %c0_25 = arith.constant 0 : index
    %98 = memref.load %arg3[%c0_24, %c0_25] : memref<1x8xf32, #tpu.memory_space<smem>>
    memref.store %33, %arg3[%c0_24, %c0_25] : memref<1x8xf32, #tpu.memory_space<smem>>
    %c0_26 = arith.constant 0 : index
    %c1 = arith.constant 1 : index
    %99 = memref.load %arg3[%c0_26, %c1] : memref<1x8xf32, #tpu.memory_space<smem>>
    memref.store %41, %arg3[%c0_26, %c1] : memref<1x8xf32, #tpu.memory_space<smem>>
    %c0_27 = arith.constant 0 : index
    %c2 = arith.constant 2 : index
    %100 = memref.load %arg3[%c0_27, %c2] : memref<1x8xf32, #tpu.memory_space<smem>>
    memref.store %52, %arg3[%c0_27, %c2] : memref<1x8xf32, #tpu.memory_space<smem>>
    %c0_28 = arith.constant 0 : index
    %c3 = arith.constant 3 : index
    %101 = memref.load %arg3[%c0_28, %c3] : memref<1x8xf32, #tpu.memory_space<smem>>
    memref.store %58, %arg3[%c0_28, %c3] : memref<1x8xf32, #tpu.memory_space<smem>>
    %c0_29 = arith.constant 0 : index
    %c4 = arith.constant 4 : index
    %102 = memref.load %arg3[%c0_29, %c4] : memref<1x8xf32, #tpu.memory_space<smem>>
    memref.store %97, %arg3[%c0_29, %c4] : memref<1x8xf32, #tpu.memory_space<smem>>
    %cst_30 = arith.constant 0.000000e+00 : f32
    %c0_31 = arith.constant 0 : index
    %c5 = arith.constant 5 : index
    %103 = memref.load %arg3[%c0_31, %c5] : memref<1x8xf32, #tpu.memory_space<smem>>
    memref.store %cst_30, %arg3[%c0_31, %c5] : memref<1x8xf32, #tpu.memory_space<smem>>
    %cst_32 = arith.constant 0.000000e+00 : f32
    %c0_33 = arith.constant 0 : index
    %c6 = arith.constant 6 : index
    %104 = memref.load %arg3[%c0_33, %c6] : memref<1x8xf32, #tpu.memory_space<smem>>
    memref.store %cst_32, %arg3[%c0_33, %c6] : memref<1x8xf32, #tpu.memory_space<smem>>
    %cst_34 = arith.constant 0.000000e+00 : f32
    %c0_35 = arith.constant 0 : index
    %c7 = arith.constant 7 : index
    %105 = memref.load %arg3[%c0_35, %c7] : memref<1x8xf32, #tpu.memory_space<smem>>
    memref.store %cst_34, %arg3[%c0_35, %c7] : memref<1x8xf32, #tpu.memory_space<smem>>
    return
  }
  func.func @transform_0(%arg0: i32) -> (i32, i32, i32) {
    %c0_i32 = arith.constant 0 : i32
    %c0_i32_0 = arith.constant 0 : i32
    %c0_i32_1 = arith.constant 0 : i32
    return %c0_i32, %c0_i32_0, %arg0 : i32, i32, i32
  }
  func.func @transform_1(%arg0: i32) -> (i32, i32, i32) {
    %c0_i32 = arith.constant 0 : i32
    %c0_i32_0 = arith.constant 0 : i32
    %c0_i32_1 = arith.constant 0 : i32
    return %c0_i32, %c0_i32_0, %arg0 : i32, i32, i32
  }
  func.func @transform_2(%arg0: i32) -> (i32, i32) {
    %c0_i32 = arith.constant 0 : i32
    %c0_i32_0 = arith.constant 0 : i32
    return %arg0, %c0_i32 : i32, i32
  }
}

</mosaic_0001>

<bundles_post_ra>
// kernel: tpu_custom_call.1
= control target key start
LH: loop header
LB: loop body
LE: loop exit
PB: predicated region body
PF: predicated region fallthrough
CT: control target
= control target key end

     0   :  { %7 = vsyncpa [#allocation3], 0  ;;  %s2249_s0 = inlined_call_operand.hbm [shape: f32[15,16,32], index: 0, kind: input, shape index: {}]   ;;  %s2250_s1 = inlined_call_operand.hbm [shape: f32[15,16,32], index: 1, kind: input, shape index: {}]   ;;  %s2251_s2 = inlined_call_operand.hbm [shape: f32[1,8], index: 2, kind: output, shape index: {}]  }
   0x1   :  { %8 = vsyncpa [#allocation6], 0 }
   0x2   :  { %9 = vsyncpa [#allocation4], 0  ;;  %s1283_s9 = smov [#allocation2]   ;;  %s1223_s13 = scalar_lea.hbm %s2249_s0, 3840 }
   0x3   :  { %s15_s10 = sshll.u32 %s1283_s9, 4  ;;  %p1224_p0 = scmp.ne.s32.totalorder %s2249_s0, %s1223_s13  ;;  %s16_s10 = int_to_ptr.vmem [resolvable:$true] %s15_s10 }
   0x4   :  { %p1227_p1 = scmp.lt.u32.totalorder %s1223_s13, %s2249_s0 }
   0x6   :  { %p1229_p2 = pnand %p1227_p1, %p1224_p0 }
   0x8   :  { %1232 = shalt.err (!%p1229_p2)
}
   0x9   :  { %s1233_s18 = scalar_lea.vmem %s16_s10, 3840  ;;  %p1238_p4 = scmp.lt.s32.totalorder %s16_s10, %s16_s10 }
   0xa   :  { %p1234_p3 = scmp.ne.s32.totalorder %s16_s10, %s1233_s18  ;;  %p1239_p5 = scmp.lt.s32.totalorder %s1233_s18, %s1233_s18 }
   0xc   :  { %p1240_p6 = por %p1239_p5, %p1238_p4 }
   0xe   :  { %p1241_p7 = pnand %p1240_p6, %p1234_p3 }
  0x10   :  { %1244 = shalt.err (!%p1241_p7)
}
  0x11   :  { %s1284_s19 = smov 128   ;;  %s1285_s20 = smov 8  }
  0x12   :  { %21 = dma.hbm_to_vmem [thread:$0]  %s2249_s0, 3840, %s16_s10, [#allocation3], %s1284_s19, %s1284_s19, %s1285_s20  }
  0x13   :  { %s1286_s23 = smov [#allocation5]   ;;  %s1245_s27 = scalar_lea.hbm %s2250_s1, 3840 }
  0x14   :  { %s27_s24 = sshll.u32 %s1286_s23, 4  ;;  %p1246_p8 = scmp.ne.s32.totalorder %s2250_s1, %s1245_s27  ;;  %s28_s24 = int_to_ptr.vmem [resolvable:$true] %s27_s24 }
  0x15   :  { %p1249_p9 = scmp.lt.u32.totalorder %s1245_s27, %s2250_s1 }
  0x17   :  { %p1251_p10 = pnand %p1249_p9, %p1246_p8 }
  0x19   :  { %1254 = shalt.err (!%p1251_p10)
}
  0x1a   :  { %s1255_s4 = scalar_lea.vmem %s28_s24, 3840  ;;  %p1260_p12 = scmp.lt.s32.totalorder %s28_s24, %s28_s24 }
  0x1b   :  { %p1256_p11 = scmp.ne.s32.totalorder %s28_s24, %s1255_s4  ;;  %p1261_p13 = scmp.lt.s32.totalorder %s1255_s4, %s1255_s4 }
  0x1d   :  { %p1262_p0 = por %p1261_p13, %p1260_p12 }
  0x1f   :  { %p1263_p1 = pnand %p1262_p0, %p1256_p11 }
  0x21   :  { %1266 = shalt.err (!%p1263_p1)
}
  0x22   :  { %33 = dma.hbm_to_vmem [thread:$0]  %s2250_s1, 3840, %s28_s24, [#allocation6], %s1284_s19, %s1284_s19, %s1285_s20  }
  0x23   :  { %1277 = dma.done.wait [#allocation3], 3840  }
  0x24   :  { %1278 = vsyncadd [#allocation3], 4294963456 }
  0x25   :  { %1279 = dma.done.wait [#allocation6], 3840  }
  0x26   :  { %1280 = vsyncadd [#allocation6], 4294963456  ;;  %v40_v0 = vld [vmem:[#allocation2] sm:$0xff]  ;;  %v41_v1 = vld [vmem:[#allocation2 + $0x8] sm:$0xff]  ;;  %v2252_v2 = vlaneseq  ;;  %vm2286_vm0 = vcmask 261120   ;;  %v1287_v30 = vmov 0.0  }
  0x27   :  { %v1050_v3 = vmul.f32 -1.442695, %v40_v0  ;;  %v1051_v4 = vmul.f32 -1.442695, %v41_v1  ;;  %v42_v5 = vld [vmem:[#allocation2 + $0x10] sm:$0xff]  ;;  %v43_v6 = vld [vmem:[#allocation2 + $0x18] sm:$0xff] }
  0x28   :  { %v44_v7 = vld [vmem:[#allocation2 + $0x20] sm:$0xff]  ;;  %v45_v8 = vld [vmem:[#allocation2 + $0x28] sm:$0xff]  ;;  %v1052_v9 = vmul.f32 -1.442695, %v42_v5  ;;  %v1330_v10 = vand.u32 127, %v2252_v2  ;;  %v46_v11 = vld [vmem:[#allocation2 + $0x30] sm:$0xff] }
  0x29   :  { %1079 = vpow2.f32 %v1050_v3  ;;  %v1053_v12 = vmul.f32 -1.442695, %v43_v6  ;;  %v1332_v13 = vld [vmem:[#allocation5] sm:$0xff]  ;;  %v47_v14 = vld [vmem:[#allocation2 + $0x38] sm:$0xff]  ;;  %v48_v15 = vld [vmem:[#allocation2 + $0x40] sm:$0xff]  ;;  %s1288_s9 = smov 0.0  }
  0x2a   :  { %2287 = vst [vmem:[#allocation11_spill] sm:$0xff] %v1330_v10  ;;  %1081 = vpow2.f32 %v1051_v4  ;;  %v1054_v16 = vmul.f32 -1.442695, %v44_v7  ;;  %v1334_v17 = vld [vmem:[#allocation5 + $0x8] sm:$0xff]  ;;  %v49_v18 = vld [vmem:[#allocation2 + $0x48] sm:$0xff]  ;;  %vm235_vm1 = vcmp.eq.f32.partialorder %v1332_v13, 0.0 }
  0x2b   :  { %1083 = vpow2.f32 %v1052_v9  ;;  %v1055_v19 = vmul.f32 -1.442695, %v45_v8  ;;  %v1056_v20 = vmul.f32 -1.442695, %v46_v11  ;;  %vm236_vm2 = vcmp.eq.f32.partialorder %v1334_v17, 0.0  ;;  %v1345_v25 = vld [vmem:[#allocation2 + $0x50] sm:$0xff] }
  0x2c   :  { %1085 = vpow2.f32 %v1053_v12  ;;  %vm2285_vm3 = vcmp.lt.s32.totalorder %v1330_v10, 32  ;;  %v1057_v21 = vmul.f32 -1.442695, %v47_v14  ;;  %v1058_v22 = vmul.f32 -1.442695, %v48_v15  ;;  %v1353_v27 = vld [vmem:[#allocation2 + $0x60] sm:$0xff] }
  0x2d   :  { %1087 = vpow2.f32 %v1054_v16  ;;  %v1059_v23 = vmul.f32 -1.442695, %v49_v18  ;;  %vm1341_vm4 = vmand %vm235_vm1, %vm2285_vm3  ;;  %v1355_v28 = vld [vmem:[#allocation2 + $0x70] sm:$0xff]  ;;  %v269_v29 = vsel %vm2286_vm0, %v1345_v25, -inf  ;;  %v1363_v32 = vld [vmem:[#allocation2 + $0x58] sm:$0xff]  ;;  %v270_v35 = vsel %vm2286_vm0, %v1353_v27, -inf }
  0x2e   :  { %1089 = vpow2.f32 %v1055_v19  ;;  %vm1349_vm5 = vmand %vm236_vm2, %vm2285_vm3  ;;  %v1361_v31 = vsel %vm1341_vm4, 1.0, %v1287_v30  ;;  %v1365_v33 = vld [vmem:[#allocation2 + $0x68] sm:$0xff]  ;;  %v1367_v34 = vld [vmem:[#allocation2 + $0x80] sm:$0xff]  ;;  %v271_v36 = vsel %vm2286_vm0, %v1355_v28, -inf  ;;  %v288_v52 = vsel %vm2286_vm0, %v1363_v32, -inf  ;;  %1030 = sst [smem:[#allocation7 + $0x5]] %s1288_s9 }
  0x2f   :  { %1091 = vpow2.f32 %v1056_v20  ;;  %v1375_v37 = vsel %vm1349_vm5, 1.0, %v1287_v30  ;;  %v1377_v38 = vld [vmem:[#allocation2 + $0x90] sm:$0xff]  ;;  %v1379_v39 = vld [vmem:[#allocation2 + $0xa0] sm:$0xff]  ;;  %v272_v40 = vmax.f32 %v269_v29, %v271_v36  ;;  %v273_v41 = vsel %vm2286_vm0, %v1367_v34, -inf  ;;  %v1383_v42 = vld [vmem:[#allocation2 + $0x78] sm:$0xff]  ;;  %1032 = sst [smem:[#allocation7 + $0x6]] %s1288_s9 }
  0x30   :  { %1093 = vpow2.f32 %v1057_v21  ;;  %v1385_v43 = vld [vmem:[#allocation2 + $0xb0] sm:$0xff]  ;;  %v274_v44 = vmax.f32 %v270_v35, %v273_v41  ;;  %v275_v45 = vsel %vm2286_vm0, %v1377_v38, -inf  ;;  %v277_v46 = vsel %vm2286_vm0, %v1379_v39, -inf  ;;  %v1391_v48 = vld [vmem:[#allocation2 + $0xc0] sm:$0xff]  ;;  %v1401_v56 = vld [vmem:[#allocation2 + $0x88] sm:$0xff]  ;;  %1034 = sst [smem:[#allocation7 + $0x7]] %s1288_s9 }
  0x31   :  { %1095 = vpow2.f32 %v1058_v22  ;;  %v1393_v49 = vld [vmem:[#allocation2 + $0xd0] sm:$0xff]  ;;  %v276_v50 = vmax.f32 %v272_v40, %v275_v45  ;;  %v279_v51 = vsel %vm2286_vm0, %v1385_v43, -inf  ;;  %v289_v53 = vsel %vm2286_vm0, %v1365_v33, -inf  ;;  %v1403_v57 = vld [vmem:[#allocation2 + $0xe0] sm:$0xff]  ;;  %v1413_v5 = vld [vmem:[#allocation2 + $0x98] sm:$0xff]  ;;  %s1267_s13 = scalar_lea.hbm %s2251_s2, 16 }
  0x32   :  { %1097 = vpow2.f32 %v1059_v23  ;;  %v278_v58 = vmax.f32 %v274_v44, %v277_v46  ;;  %v281_v59 = vsel %vm2286_vm0, %v1391_v48, -inf  ;;  %v283_v60 = vsel %vm2286_vm0, %v1393_v49, -inf  ;;  %v1415_v6 = vld [vmem:[#allocation2 + $0xa8] sm:$0xff]  ;;  %v1419_v18 = vld [vmem:[#allocation2 + $0xb8] sm:$0xff]  ;;  %p1268_p2 = scmp.ne.s32.totalorder %s2251_s2, %s1267_s13  ;;  %p1271_p3 = scmp.lt.u32.totalorder %s1267_s13, %s2251_s2 }
  0x33   :  { %v1080_v47 = vpop.eup %1079  ;;  %v280_v63 = vmax.f32 %v276_v50, %v279_v51  ;;  %v285_v0 = vsel %vm2286_vm0, %v1403_v57, -inf  ;;  %v290_v1 = vsel %vm2286_vm0, %v1383_v42, -inf  ;;  %v292_v14 = vsel %vm2286_vm0, %v1401_v56, -inf  ;;  %v1421_v23 = vld [vmem:[#allocation2 + $0xc8] sm:$0xff]  ;;  %v1427_v40 = vld [vmem:[#allocation2 + $0xd8] sm:$0xff] }
  0x34   :  { %v1082_v54 = vpop.eup %1081  ;;  %v112_v55 = vadd.f32 1.0, %v1080_v47  ;;  %v282_v7 = vmax.f32 %v278_v58, %v281_v59  ;;  %v291_v8 = vmax.f32 %v288_v52, %v290_v1  ;;  %v293_v20 = vmax.f32 %v289_v53, %v292_v14  ;;  %v1431_v47 = vld [vmem:[#allocation2 + $0xe8] sm:$0xff]  ;;  %p1273_p4 = pnand %p1271_p3, %p1268_p2 }
  0x35   :  { %v1084_v61 = vpop.eup %1083  ;;  %v113_v62 = vadd.f32 1.0, %v1082_v54  ;;  %v284_v12 = vmax.f32 %v280_v63, %v283_v60  ;;  %v294_v29 = vsel %vm2286_vm0, %v1413_v5, -inf  ;;  %v296_v30 = vsel %vm2286_vm0, %v1415_v6, -inf }
  0x36   :  { %v1086_v3 = vpop.eup %1085  ;;  %1099 = vrcp.f32 %v112_v55  ;;  %v142_v4 = vadd.f32 1.0, %v1084_v61  ;;  %v286_v19 = vmax.f32 %v282_v7, %v285_v0  ;;  %v295_v44 = vmax.f32 %v291_v8, %v294_v29 }
  0x37   :  { %v1088_v9 = vpop.eup %1087  ;;  %1101 = vrcp.f32 %v113_v62  ;;  %v143_v11 = vadd.f32 1.0, %v1086_v3  ;;  %v297_v50 = vmax.f32 %v293_v20, %v296_v30  ;;  %v298_v51 = vsel %vm2286_vm0, %v1419_v18, -inf  ;;  %v76_v30 = vld [vmem:[#allocation5 + $0x30] sm:$0xff] }
  0x38   :  { %v1090_v15 = vpop.eup %1089  ;;  %v144_v16 = vadd.f32 1.0, %v1088_v9  ;;  %1103 = vrcp.f32 %v142_v4  ;;  %v1429_v41 = vmax.f32 %v284_v12, %v286_v19  ;;  %v299_v54 = vmax.f32 %v295_v44, %v298_v51  ;;  %v72_v4 = vld [vmem:[#allocation5 + $0x10] sm:$0xff] }
  0x39   :  { %v1092_v21 = vpop.eup %1091  ;;  %v145_v22 = vadd.f32 1.0, %v1090_v15  ;;  %1105 = vrcp.f32 %v143_v11  ;;  %v300_v55 = vsel %vm2286_vm0, %v1421_v23, -inf  ;;  %v302_v60 = vsel %vm2286_vm0, %v1427_v40, -inf  ;;  %v73_v11 = vld [vmem:[#allocation5 + $0x18] sm:$0xff]  ;;  %v74_v15 = vld [vmem:[#allocation5 + $0x20] sm:$0xff] }
  0x3a   :  { %v1094_v35 = vpop.eup %1093  ;;  %v146_v36 = vadd.f32 1.0, %v1092_v21  ;;  %1107 = vrcp.f32 %v144_v16  ;;  %v301_v59 = vmax.f32 %v297_v50, %v300_v55  ;;  %v257_v61 = vsel %vm2286_vm0, %v1361_v31, 0.0  ;;  %v75_v21 = vld [vmem:[#allocation5 + $0x28] sm:$0xff]  ;;  %v77_v50 = vld [vmem:[#allocation5 + $0x38] sm:$0xff] }
  0x3b   :  { %v1096_v45 = vpop.eup %1095  ;;  %v147_v46 = vadd.f32 1.0, %v1094_v35  ;;  %1109 = vrcp.f32 %v145_v22  ;;  %v304_v62 = vsel %vm2286_vm0, %v1431_v47, -inf  ;;  %v258_v63 = vsel %vm2286_vm0, %v1375_v37, 0.0 }
  0x3c   :  { %v1098_v52 = vpop.eup %1097  ;;  %v148_v53 = vadd.f32 1.0, %v1096_v45  ;;  %1111 = vrcp.f32 %v146_v36  ;;  %v303_v0 = vmax.f32 %v299_v54, %v302_v60  ;;  %v305_v1 = vmax.f32 %v301_v59, %v304_v62  ;;  %v78_v59 = vld [vmem:[#allocation5 + $0x40] sm:$0xff] }
  0x3d   :  { %v149_v58 = vadd.f32 1.0, %v1098_v52  ;;  %1113 = vrcp.f32 %v147_v46  ;;  %v307_v7 = vsub.f32 %v1345_v25, %v1429_v41  ;;  %v309_v8 = vsub.f32 %v1353_v27, %v1429_v41 }
  0x3e   :  { %1115 = vrcp.f32 %v148_v53  ;;  %v1451_v16 = vadd.f32 %v258_v63, %v257_v61  ;;  %v311_v37 = vsub.f32 %v1355_v28, %v1429_v41  ;;  %v313_v19 = vsub.f32 %v1367_v34, %v1429_v41 }
  0x3f   :  { %1117 = vrcp.f32 %v149_v58  ;;  %v1457_v22 = vmax.f32 %v303_v0, %v305_v1  ;;  %v327_v36 = vmul.f32 1.442695, %v307_v7  ;;  %v331_v44 = vmul.f32 1.442695, %v309_v8  ;;  %v79_v0 = vld [vmem:[#allocation5 + $0x48] sm:$0xff] }
  0x40   :  { %v1100_v3 = vpop.eup %1099 }
  0x41   :  { %v1102_v9 = vpop.eup %1101  ;;  %v166_v31 = vsub.f32 %v1100_v3, %v1332_v13  ;;  %v315_v13 = vsub.f32 %v1377_v38, %v1429_v41  ;;  %1119 = vpow2.f32 %v327_v36  ;;  %v318_v36 = vsub.f32 %v1415_v6, %v1457_v22 }
  0x42   :  { %v1104_v12 = vpop.eup %1103  ;;  %v167_v14 = vsub.f32 %v1102_v9, %v1334_v17  ;;  %1121 = vpow2.f32 %v331_v44  ;;  %v320_v28 = vsub.f32 %v1419_v18, %v1457_v22  ;;  %v322_v34 = vsub.f32 %v1421_v23, %v1457_v22  ;;  %v1533_v18 = vld [vmem:[#allocation5 + $0x50] sm:$0xff] }
  0x43   :  { %v1106_v25 = vpop.eup %1105  ;;  %v176_v20 = vmul.f32 %v166_v31, %v166_v31  ;;  %v168_v27 = vsub.f32 %v1104_v12, %v72_v4  ;;  %v325_v38 = vsub.f32 %v1403_v57, %v1429_v41  ;;  %v349_v23 = vmul.f32 1.442695, %v318_v36 }
  0x44   :  { %v1108_v29 = vpop.eup %1107  ;;  %v177_v17 = vmul.f32 %v167_v14, %v167_v14  ;;  %v169_v35 = vsub.f32 %v1106_v25, %v73_v11 }
  0x45   :  { %v1110_v45 = vpop.eup %1109  ;;  %v221_v46 = vsel %vm2285_vm3, %v176_v20, 0.0  ;;  %v170_v51 = vsub.f32 %v1108_v29, %v74_v15  ;;  %v178_v52 = vmul.f32 %v168_v27, %v168_v27  ;;  %v239_v53 = vsel %vm1341_vm4, %v176_v20, 0.0 }
  0x46   :  { %v1112_v54 = vpop.eup %1111  ;;  %v222_v55 = vsel %vm2285_vm3, %v177_v17, 0.0  ;;  %v223_v58 = vsel %vm2286_vm0, %v221_v46, 0.0  ;;  %v171_v60 = vsub.f32 %v1110_v45, %v75_v21  ;;  %v179_v61 = vmul.f32 %v169_v35, %v169_v35 }
  0x47   :  { %v1114_v62 = vpop.eup %1113  ;;  %v224_v63 = vsel %vm2286_vm0, %v222_v55, 0.0  ;;  %v172_v1 = vsub.f32 %v1112_v54, %v76_v30  ;;  %v180_v3 = vmul.f32 %v170_v51, %v170_v51  ;;  %v188_v4 = vsel %vm2285_vm3, %v178_v52, 0.0 }
  0x48   :  { %v1116_v24 = vpop.eup %1115  ;;  %v225_v7 = vadd.f32 %v224_v63, %v223_v58  ;;  %v173_v8 = vsub.f32 %v1114_v62, %v77_v50  ;;  %v181_v9 = vmul.f32 %v171_v60, %v171_v60  ;;  %v189_v31 = vsel %vm2285_vm3, %v179_v61, 0.0 }
  0x49   :  { %v1118_v11 = vpop.eup %1117  ;;  %v174_v12 = vsub.f32 %v1116_v24, %v78_v59  ;;  %v182_v14 = vmul.f32 %v172_v1, %v172_v1  ;;  %v190_v15 = vsel %vm2285_vm3, %v180_v3, 0.0  ;;  %v197_v25 = vsel %vm2286_vm0, %v188_v4, 0.0 }
  0x4a   :  { %226 = vadd.xlane.f32.xlu0 %v225_v7  ;;  %v175_v20 = vsub.f32 %v1118_v11, %v79_v0  ;;  %v183_v21 = vmul.f32 %v173_v8, %v173_v8  ;;  %v191_v27 = vsel %vm2285_vm3, %v181_v9, 0.0  ;;  %v198_v29 = vsel %vm2286_vm0, %v189_v31, 0.0 }
  0x4b   :  { %v184_v30 = vmul.f32 %v174_v12, %v174_v12  ;;  %v192_v35 = vsel %vm2285_vm3, %v182_v14, 0.0  ;;  %v199_v45 = vadd.f32 %v198_v29, %v197_v25  ;;  %v200_v46 = vsel %vm2286_vm0, %v190_v15, 0.0  ;;  %v1535_v14 = vld [vmem:[#allocation5 + $0x58] sm:$0xff]  ;;  %v1545_v29 = vpop.eup %1119 }
  0x4c   :  { %v185_v50 = vmul.f32 %v175_v20, %v175_v20  ;;  %v202_v51 = vsel %vm2286_vm0, %v191_v27, 0.0  ;;  %v308_v52 = vsub.f32 %v1363_v32, %v1457_v22  ;;  %v310_v54 = vsub.f32 %v1365_v33, %v1457_v22 }
  0x4d   :  { %v193_v55 = vsel %vm2285_vm3, %v183_v21, 0.0  ;;  %v194_v58 = vsel %vm2285_vm3, %v184_v30, 0.0  ;;  %v201_v59 = vadd.f32 %v200_v46, %v199_v45  ;;  %v240_v60 = vsel %vm1349_vm5, %v177_v17, 0.0 }
  0x4e   :  { %v204_v61 = vsel %vm2286_vm0, %v192_v35, 0.0  ;;  %v241_v62 = vsel %vm2286_vm0, %v239_v53, 0.0  ;;  %v242_v63 = vsel %vm2286_vm0, %v240_v60, 0.0  ;;  %v312_v32 = vsub.f32 %v1383_v42, %v1457_v22  ;;  %v1551_v35 = vpop.eup %1121 }
  0x4f   :  { %v203_v33 = vadd.f32 %v202_v51, %v201_v59  ;;  %v243_v0 = vadd.f32 %v242_v63, %v241_v62  ;;  %v317_v1 = vsub.f32 %v1379_v39, %v1429_v41  ;;  %v319_v3 = vsub.f32 %v1385_v43, %v1429_v41  ;;  %v1563_v51 = vld [vmem:[#allocation5 + $0x78] sm:$0xff]  ;;  %v1569_v59 = vld [vmem:[#allocation5 + $0x80] sm:$0xff] }
  0x50   :  { %v195_v26 = vsel %vm2285_vm3, %v185_v50, 0.0  ;;  %v206_v17 = vsel %vm2286_vm0, %v193_v55, 0.0  ;;  %v208_v53 = vsel %vm2286_vm0, %v194_v58, 0.0  ;;  %v314_v4 = vsub.f32 %v1401_v56, %v1457_v22 }
  0x51   :  { %v205_v24 = vadd.f32 %v204_v61, %v203_v33  ;;  %244 = vadd.xlane.f32.xlu1 %v243_v0  ;;  %v316_v42 = vsub.f32 %v1413_v5, %v1457_v22  ;;  %v329_v39 = vmul.f32 1.442695, %v308_v52  ;;  %v333_v7 = vmul.f32 1.442695, %v310_v54 }
  0x52   :  { %v335_v43 = vmul.f32 1.442695, %v311_v37  ;;  %v337_v8 = vmul.f32 1.442695, %v312_v32  ;;  %v321_v31 = vsub.f32 %v1391_v48, %v1429_v41  ;;  %v339_v56 = vmul.f32 1.442695, %v313_v19 }
  0x53   :  { %v207_v9 = vadd.f32 %v206_v17, %v205_v24  ;;  %1123 = vpow2.f32 %v329_v39  ;;  %v210_v5 = vsel %vm2286_vm0, %v195_v26, 0.0  ;;  %v341_v44 = vmul.f32 1.442695, %v314_v4  ;;  %v1575_v32 = vld [vmem:[#allocation5 + $0x88] sm:$0xff] }
  0x54   :  { %1125 = vpow2.f32 %v333_v7  ;;  %v343_v48 = vmul.f32 1.442695, %v315_v13  ;;  %v323_v37 = vsub.f32 %v1393_v49, %v1429_v41  ;;  %v345_v6 = vmul.f32 1.442695, %v316_v42  ;;  %v1539_v13 = vld [vmem:[#allocation5 + $0x60] sm:$0xff]  ;;  %v1541_v49 = vld [vmem:[#allocation5 + $0x68] sm:$0xff] }
  0x55   :  { %v209_v11 = vadd.f32 %v208_v53, %v207_v9  ;;  %260 = vadd.xlane.f32.xlu1 %v1451_v16  ;;  %1127 = vpow2.f32 %v335_v43  ;;  %v324_v16 = vsub.f32 %v1427_v40, %v1457_v22  ;;  %v347_v12 = vmul.f32 1.442695, %v317_v1 }
  0x56   :  { %1129 = vpow2.f32 %v337_v8  ;;  %v326_v15 = vsub.f32 %v1431_v47, %v1457_v22  ;;  %v351_v40 = vmul.f32 1.442695, %v319_v3  ;;  %v353_v25 = vmul.f32 1.442695, %v320_v28  ;;  %v1553_v47 = vld [vmem:[#allocation5 + $0x70] sm:$0xff] }
  0x57   :  { %v211_v19 = vadd.f32 %v210_v5, %v209_v11  ;;  %1131 = vpow2.f32 %v339_v56  ;;  %v355_v20 = vmul.f32 1.442695, %v321_v31  ;;  %v357_v21 = vmul.f32 1.442695, %v322_v34 }
  0x58   :  { %1133 = vpow2.f32 %v341_v44  ;;  %v359_v27 = vmul.f32 1.442695, %v323_v37  ;;  %v361_v57 = vmul.f32 1.442695, %v324_v16  ;;  %v580_v41 = vsel %vm2286_vm0, %v1533_v18, -inf  ;;  %v1609_v37 = vld [vmem:[#allocation5 + $0x90] sm:$0xff] }
  0x59   :  { %212 = vadd.xlane.f32.xlu0 %v211_v19  ;;  %1135 = vpow2.f32 %v343_v48  ;;  %v581_v30 = vsel %vm2286_vm0, %v1535_v14, -inf  ;;  %v367_v22 = vsel %vm2286_vm0, %v1545_v29, 0.0  ;;  %v589_v45 = vsel %vm2286_vm0, %v1539_v13, -inf }
  0x5a   :  { %1137 = vpow2.f32 %v345_v6  ;;  %v590_v46 = vsel %vm2286_vm0, %v1541_v49, -inf  ;;  %v363_v52 = vmul.f32 1.442695, %v325_v38  ;;  %v365_v54 = vmul.f32 1.442695, %v326_v15  ;;  %v1615_v38 = vld [vmem:[#allocation5 + $0x98] sm:$0xff] }
  0x5b   :  { %1139 = vpow2.f32 %v347_v12  ;;  %v368_v55 = vsel %vm2286_vm0, %v1551_v35, 0.0  ;;  %v582_v62 = vmax.f32 %v580_v41, %v581_v30  ;;  %v591_v0 = vmax.f32 %v589_v45, %v590_v46 }
  0x5c   :  { %1141 = vpow2.f32 %v349_v23  ;;  %v369_v60 = vadd.f32 %v368_v55, %v367_v22  ;;  %v598_v1 = vsel %vm2286_vm0, %v1553_v47, -inf  ;;  %v599_v53 = vsel %vm2286_vm0, %v1563_v51, -inf }
  0x5d   :  { %v1561_v50 = vpop.eup %1123  ;;  %1143 = vpow2.f32 %v351_v40  ;;  %v607_v39 = vsel %vm2286_vm0, %v1569_v59, -inf  ;;  %v608_v9 = vsel %vm2286_vm0, %v1575_v32, -inf  ;;  %v600_v36 = vmax.f32 %v598_v1, %v599_v53  ;;  %v1641_v1 = vld [vmem:[#allocation5 + $0xa8] sm:$0xff] }
  0x5e   :  { %v1567_v58 = vpop.eup %1125  ;;  %1145 = vpow2.f32 %v353_v25  ;;  %v386_v61 = vsel %vm2286_vm0, %v1561_v50, 0.0  ;;  %v583_v48 = vrot.slane %v582_v62, 4  ;;  %v592_v16 = vrot.slane %v591_v0, 4  ;;  %2293 = vst [vmem:[#allocation13_spill] sm:$0xff] %v1641_v1 }
  0x5f   :  { %v1573_v63 = vpop.eup %1127  ;;  %1147 = vpow2.f32 %v355_v20  ;;  %v387_v33 = vsel %vm2286_vm0, %v1567_v58, 0.0  ;;  %v609_v40 = vmax.f32 %v607_v39, %v608_v9  ;;  %v616_v45 = vsel %vm2286_vm0, %v1609_v37, -inf }
  0x60   :  { %v1581_v3 = vpop.eup %1129  ;;  %1149 = vpow2.f32 %v357_v21  ;;  %v370_v26 = vsel %vm2286_vm0, %v1573_v63, 0.0  ;;  %v388_v17 = vadd.f32 %v387_v33, %v386_v61  ;;  %v1627_v22 = vmax.f32 %v582_v62, %v583_v48  ;;  %v1659_v48 = vld [vmem:[#allocation5 + $0xb8] sm:$0xff] }
  0x61   :  { %v1587_v4 = vpop.eup %1131  ;;  %1151 = vpow2.f32 %v359_v27  ;;  %v371_v24 = vadd.f32 %v370_v26, %v369_v60  ;;  %v389_v42 = vsel %vm2286_vm0, %v1581_v3, 0.0  ;;  %v601_v27 = vrot.slane %v600_v36, 4  ;;  %2295 = vst [vmem:[#allocation15_spill] sm:$0xff] %v1659_v48 }
  0x62   :  { %v1593_v7 = vpop.eup %1133  ;;  %1153 = vpow2.f32 %v361_v57  ;;  %v372_v43 = vsel %vm2286_vm0, %v1587_v4, 0.0  ;;  %v390_v8 = vadd.f32 %v389_v42, %v388_v17  ;;  %v593_v60 = vmax.f32 %v591_v0, %v592_v16 }
  0x63   :  { %v1599_v31 = vpop.eup %1135  ;;  %1155 = vpow2.f32 %v363_v52  ;;  %v373_v56 = vadd.f32 %v372_v43, %v371_v24  ;;  %v391_v5 = vsel %vm2286_vm0, %v1593_v7, 0.0  ;;  %v1633_v52 = vld [vmem:[#allocation5 + $0xa0] sm:$0xff]  ;;  %v617_v61 = vsel %vm2286_vm0, %v1615_v38, -inf }
  0x64   :  { %v1603_v44 = vpop.eup %1137  ;;  %1157 = vpow2.f32 %v365_v54  ;;  %v374_v11 = vsel %vm2286_vm0, %v1599_v31, 0.0  ;;  %v392_v28 = vadd.f32 %v391_v5, %v390_v8  ;;  %2292 = vst [vmem:[#allocation12_spill] sm:$0xff] %v1633_v52  ;;  %v610_v17 = vrot.slane %v609_v40, 4  ;;  %v1651_v8 = vld [vmem:[#allocation5 + $0xb0] sm:$0xff] }
  0x65   :  { %v1607_v34 = vpop.eup %1139  ;;  %v375_v6 = vadd.f32 %v374_v11, %v373_v56  ;;  %v393_v19 = vsel %vm2286_vm0, %v1603_v44, 0.0  ;;  %v618_v53 = vmax.f32 %v616_v45, %v617_v61  ;;  %v602_v0 = vmax.f32 %v600_v36, %v601_v27  ;;  %2294 = vst [vmem:[#allocation14_spill] sm:$0xff] %v1651_v8  ;;  %v1674_v45 = vld [vmem:[#allocation5 + $0xd0] sm:$0xff] }
  0x66   :  { %v1613_v12 = vpop.eup %1141  ;;  %v376_v23 = vsel %vm2286_vm0, %v1607_v34, 0.0  ;;  %v394_v15 = vadd.f32 %v393_v19, %v392_v28  ;;  %v625_v11 = vsel %vm2286_vm0, %v1633_v52, -inf  ;;  %v585_v19 = vrot.slane %v1627_v22, 2  ;;  %2298 = vst [vmem:[#allocation18_spill] sm:$0xff] %v1674_v45 }
  0x67   :  { %v1619_v25 = vpop.eup %1143  ;;  %v377_v20 = vadd.f32 %v376_v23, %v375_v6  ;;  %v395_v21 = vsel %vm2286_vm0, %v1613_v12, 0.0  ;;  %v619_v5 = vrot.slane %v618_v53, 4  ;;  %v626_v16 = vsel %vm2286_vm0, %v1641_v1, -inf }
  0x68   :  { %v1623_v57 = vpop.eup %1145  ;;  %v378_v41 = vsel %vm2286_vm0, %v1619_v25, 0.0  ;;  %v396_v30 = vadd.f32 %v395_v21, %v394_v15  ;;  %v1668_v15 = vld [vmem:[#allocation5 + $0xc0] sm:$0xff]  ;;  %v594_v27 = vrot.slane %v593_v60, 2  ;;  %v627_v61 = vmax.f32 %v625_v11, %v626_v16  ;;  %v1688_v11 = vld [vmem:[#allocation5 + $0xe8] sm:$0xff] }
  0x69   :  { %v1631_v46 = vpop.eup %1147  ;;  %v379_v54 = vadd.f32 %v378_v41, %v377_v20  ;;  %v397_v55 = vsel %vm2286_vm0, %v1623_v57, 0.0  ;;  %2296 = vst [vmem:[#allocation16_spill] sm:$0xff] %v1668_v15  ;;  %v611_v41 = vmax.f32 %v609_v40, %v610_v17  ;;  %v635_v40 = vsel %vm2286_vm0, %v1659_v48, -inf  ;;  %2301 = vst [vmem:[#allocation21_spill] sm:$0xff] %v1688_v11 }
  0x6a   :  { %v1639_v33 = vpop.eup %1149  ;;  %v380_v62 = vsel %vm2286_vm0, %v1631_v46, 0.0  ;;  %v398_v26 = vadd.f32 %v397_v55, %v396_v30  ;;  %v1672_v30 = vld [vmem:[#allocation5 + $0xc8] sm:$0xff]  ;;  %v628_v17 = vrot.slane %v627_v61, 4  ;;  %v586_v2 = vmax.f32 %v1627_v22, %v585_v19 }
  0x6b   :  { %v1645_v24 = vpop.eup %1151  ;;  %v381_v42 = vadd.f32 %v380_v62, %v379_v54  ;;  %v399_v39 = vsel %vm2286_vm0, %v1639_v33, 0.0  ;;  %2297 = vst [vmem:[#allocation17_spill] sm:$0xff] %v1672_v30  ;;  %v634_v62 = vsel %vm2286_vm0, %v1651_v8, -inf  ;;  %v612_v16 = vrot.slane %v611_v41, 2 }
  0x6c   :  { %v1649_v43 = vpop.eup %1153  ;;  %v382_v9 = vsel %vm2286_vm0, %v1645_v24, 0.0  ;;  %v400_v56 = vadd.f32 %v399_v39, %v398_v26  ;;  %v1680_v26 = vld [vmem:[#allocation5 + $0xd8] sm:$0xff]  ;;  %v603_v39 = vrot.slane %v602_v0, 2  ;;  %v662_v10 = vsel %vm2286_vm0, %v1688_v11, -inf }
  0x6d   :  { %v1657_v28 = vpop.eup %1155  ;;  %v383_v6 = vadd.f32 %v382_v9, %v381_v42  ;;  %v401_v36 = vsel %vm2286_vm0, %v1649_v43, 0.0  ;;  %2299 = vst [vmem:[#allocation19_spill] sm:$0xff] %v1680_v26  ;;  %v620_v9 = vmax.f32 %v618_v53, %v619_v5  ;;  %v652_v53 = vsel %vm2286_vm0, %v1674_v45, -inf }
  0x6e   :  { %v1666_v23 = vpop.eup %1157  ;;  %v384_v20 = vsel %vm2286_vm0, %v1657_v28, 0.0  ;;  %v402_v21 = vadd.f32 %v401_v36, %v400_v56  ;;  %v636_v56 = vmax.f32 %v634_v62, %v635_v40  ;;  %v1686_v36 = vld [vmem:[#allocation5 + $0xe0] sm:$0xff]  ;;  %v629_v5 = vmax.f32 %v627_v61, %v628_v17 }
  0x6f   :  { %v385_v54 = vadd.f32 %v384_v20, %v383_v6  ;;  %v403_v55 = vsel %vm2286_vm0, %v1666_v23, 0.0  ;;  %v643_v6 = vsel %vm2286_vm0, %v1668_v15, -inf  ;;  %2300 = vst [vmem:[#allocation20_spill] sm:$0xff] %v1686_v36  ;;  %v644_v20 = vsel %vm2286_vm0, %v1672_v30, -inf }
  0x70   :  { %v404_v42 = vadd.f32 %v403_v55, %v402_v21  ;;  %v637_v21 = vrot.slane %v636_v56, 4  ;;  %v653_v55 = vsel %vm2286_vm0, %v1680_v26, -inf  ;;  %v621_v62 = vrot.slane %v620_v9, 2 }
  0x71   :  { %1159 = vrcp.f32 %v385_v54  ;;  %v645_v54 = vmax.f32 %v643_v6, %v644_v20  ;;  %v654_v40 = vmax.f32 %v652_v53, %v653_v55  ;;  %v595_v30 = vmax.f32 %v593_v60, %v594_v27 }
  0x72   :  { %1161 = vrcp.f32 %v404_v42  ;;  %v661_v42 = vsel %vm2286_vm0, %v1686_v36, -inf  ;;  %v630_v15 = vrot.slane %v629_v5, 2  ;;  %v638_v48 = vmax.f32 %v636_v56, %v637_v21 }
  0x73   :  { %v604_v45 = vmax.f32 %v602_v0, %v603_v39  ;;  %v613_v61 = vmax.f32 %v611_v41, %v612_v16  ;;  %v646_v17 = vrot.slane %v645_v54, 4  ;;  %v2302_v6 = vlaneseq }
  0x74   :  { %v622_v26 = vmax.f32 %v620_v9, %v621_v62  ;;  %v655_v8 = vrot.slane %v654_v40, 4  ;;  %v663_v53 = vmax.f32 %v661_v42, %v662_v10  ;;  %v587_v55 = vrot.slane %v586_v2, 1 }
  0x75   :  { %v1702_v20 = vshrl.u32 %v2302_v6, 7  ;;  %v596_v22 = vrot.slane %v595_v30, 1  ;;  %v631_v19 = vmax.f32 %v629_v5, %v630_v15  ;;  %v639_v1 = vrot.slane %v638_v48, 2 }
  0x76   :  { %v605_v52 = vrot.slane %v604_v45, 1  ;;  %v614_v11 = vrot.slane %v613_v61, 1  ;;  %v647_v60 = vmax.f32 %v645_v54, %v646_v17  ;;  %v623_v41 = vrot.slane %v622_v26, 1 }
  0x77   :  { %v1707_v0 = vadd.s32 8, %v1702_v20  ;;  %v656_v39 = vmax.f32 %v654_v40, %v655_v8  ;;  %v664_v56 = vrot.slane %v663_v53, 4  ;;  %v1720_v16 = vmax.f32 %v586_v2, %v587_v55 }
  0x78   :  { %v1725_v21 = vmax.f32 %v595_v30, %v596_v22  ;;  %v632_v8 = vrot.slane %v631_v19, 1  ;;  %v640_v54 = vmax.f32 %v638_v48, %v639_v1  ;;  %v1731_v62 = vmax.f32 %v604_v45, %v605_v52 }
  0x79   :  { %v648_v40 = vrot.slane %v647_v60, 2  ;;  %v1738_v2 = vmax.f32 %v622_v26, %v623_v41  ;;  %v665_v42 = vmax.f32 %v663_v53, %v664_v56  ;;  %vm670_vm6 = vcmp.eq.f32.partialorder %v1533_v18, %v1720_v16 }
  0x7a   :  { %v1751_v45 = vmax.f32 %v631_v19, %v632_v8  ;;  %v641_v26 = vrot.slane %v640_v54, 1  ;;  %vm671_vm7 = vcmp.eq.f32.partialorder %v1535_v14, %v1720_v16  ;;  %vm672_vm8 = vcmp.eq.f32.partialorder %v1539_v13, %v1725_v21 }
  0x7b   :  { %v1704_v36 = vpop.eup %1159  ;;  %v666_v6 = vrot.slane %v665_v42, 2  ;;  %vm673_vm9 = vcmp.eq.f32.partialorder %v1541_v49, %v1725_v21  ;;  %vm674_vm10 = vcmp.eq.f32.partialorder %v1553_v47, %v1731_v62  ;;  %vm675_vm11 = vcmp.eq.f32.partialorder %v1563_v51, %v1731_v62 }
  0x7c   :  { %v1162_v27 = vpop.eup %1161  ;;  %v1711_v9 = vmul.f32 %v1704_v36, %v1545_v29  ;;  %v1718_v15 = vmul.f32 %v1704_v36, %v1551_v35  ;;  %v1729_v29 = vmul.f32 %v1704_v36, %v1573_v63  ;;  %v1742_v30 = vmul.f32 %v1704_v36, %v1587_v4 }
  0x7d   :  { %v1714_v10 = vmul.f32 %v1162_v27, %v1561_v50  ;;  %v1723_v5 = vmul.f32 %v1162_v27, %v1567_v58  ;;  %v1733_v50 = vmax.f32 %v613_v61, %v614_v11  ;;  %v1736_v35 = vmul.f32 %v1162_v27, %v1581_v3 }
  0x7e   :  { %v657_v58 = vrot.slane %v656_v39, 2  ;;  %v427_v1 = vmul.f32 1.442695, %v1711_v9  ;;  %v431_v52 = vmul.f32 1.442695, %v1718_v15  ;;  %v1748_v48 = vmul.f32 %v1162_v27, %v1593_v7 }
  0x7f   :  { %v429_v63 = vmul.f32 1.442695, %v1714_v10  ;;  %v433_v3 = vmul.f32 1.442695, %v1723_v5  ;;  %v1755_v11 = vmul.f32 %v1704_v36, %v1599_v31  ;;  %v435_v4 = vmul.f32 1.442695, %v1729_v29 }
  0x80   :  { %1163 = vpow2.f32 %v427_v1  ;;  %v649_v61 = vmax.f32 %v647_v60, %v648_v40  ;;  %v1759_v17 = vmul.f32 %v1162_v27, %v1603_v44  ;;  %v437_v7 = vmul.f32 1.442695, %v1736_v35 }
  0x81   :  { %1165 = vpow2.f32 %v429_v63  ;;  %v1764_v53 = vmul.f32 %v1704_v36, %v1607_v34  ;;  %v1767_v55 = vmul.f32 %v1162_v27, %v1613_v12  ;;  %v439_v31 = vmul.f32 1.442695, %v1742_v30 }
  0x82   :  { %1167 = vpow2.f32 %v431_v52  ;;  %v1772_v22 = vmul.f32 %v1704_v36, %v1619_v25  ;;  %v1775_v44 = vmul.f32 %v1162_v27, %v1623_v57  ;;  %v441_v19 = vmul.f32 1.442695, %v1748_v48 }
  0x83   :  { %2303 = vst [vmem:[#allocation22_spill] sm:$0xff] %v1764_v53  ;;  %2304 = vst [vmem:[#allocation23_spill] sm:$0xff] %v1767_v55  ;;  %1169 = vpow2.f32 %v433_v3  ;;  %v1782_v34 = vmul.f32 %v1704_v36, %v1631_v46  ;;  %v1785_v12 = vmul.f32 %v1162_v27, %v1639_v33  ;;  %v443_v25 = vmul.f32 1.442695, %v1755_v11 }
  0x84   :  { %2305 = vst [vmem:[#allocation24_spill] sm:$0xff] %v1772_v22  ;;  %2306 = vst [vmem:[#allocation25_spill] sm:$0xff] %v1775_v44  ;;  %1171 = vpow2.f32 %v435_v4  ;;  %v1790_v57 = vmul.f32 %v1704_v36, %v1645_v24  ;;  %v445_v60 = vmul.f32 1.442695, %v1759_v17  ;;  %v658_v41 = vmax.f32 %v656_v39, %v657_v58 }
  0x85   :  { %2307 = vst [vmem:[#allocation26_spill] sm:$0xff] %v1782_v34  ;;  %2308 = vst [vmem:[#allocation27_spill] sm:$0xff] %v1785_v12  ;;  %1173 = vpow2.f32 %v437_v7  ;;  %v1798_v46 = vmul.f32 %v1162_v27, %v1649_v43  ;;  %v447_v33 = vmul.f32 1.442695, %v1764_v53  ;;  %v667_v56 = vmax.f32 %v665_v42, %v666_v6 }
  0x86   :  { %2309 = vst [vmem:[#allocation28_spill] sm:$0xff] %v1790_v57  ;;  %1175 = vpow2.f32 %v439_v31  ;;  %v1803_v24 = vmul.f32 %v1704_v36, %v1657_v28  ;;  %v1806_v8 = vmul.f32 %v1162_v27, %v1666_v23  ;;  %v449_v39 = vmul.f32 1.442695, %v1767_v55 }
  0x87   :  { %2310 = vst [vmem:[#allocation29_spill] sm:$0xff] %v1798_v46  ;;  %1177 = vpow2.f32 %v441_v19  ;;  %v451_v43 = vmul.f32 1.442695, %v1772_v22  ;;  %v1812_v40 = vmax.f32 %v640_v54, %v641_v26  ;;  %v650_v58 = vrot.slane %v649_v61, 1  ;;  %v2319_v22 = vld [vmem:[#allocation18_spill] sm:$0xff] }
  0x88   :  { %2311 = vst [vmem:[#allocation30_spill] sm:$0xff] %v1803_v24  ;;  %2312 = vst [vmem:[#allocation31_spill] sm:$0xff] %v1806_v8  ;;  %1179 = vpow2.f32 %v443_v25  ;;  %v453_v42 = vmul.f32 1.442695, %v1775_v44  ;;  %v455_v28 = vmul.f32 1.442695, %v1782_v34  ;;  %vm676_vm12 = vcmp.eq.f32.partialorder %v1569_v59, %v1733_v50 }
  0x89   :  { %1181 = vpow2.f32 %v445_v60  ;;  %v659_v36 = vrot.slane %v658_v41, 1  ;;  %v457_v27 = vmul.f32 1.442695, %v1785_v12  ;;  %v459_v1 = vmul.f32 1.442695, %v1790_v57  ;;  %v2316_v12 = vld [vmem:[#allocation15_spill] sm:$0xff] }
  0x8a   :  { %v1164_v23 = vpop.eup %1163  ;;  %1183 = vpow2.f32 %v447_v33  ;;  %v668_v63 = vrot.slane %v667_v56, 1  ;;  %v461_v54 = vmul.f32 1.442695, %v1798_v46  ;;  %v463_v3 = vmul.f32 1.442695, %v1803_v24  ;;  %v2317_v34 = vld [vmem:[#allocation16_spill] sm:$0xff] }
  0x8b   :  { %v1166_v52 = vpop.eup %1165  ;;  %1185 = vpow2.f32 %v449_v39  ;;  %v467_v26 = vsel %vm2286_vm0, %v1164_v23, 0.0  ;;  %v465_v7 = vmul.f32 1.442695, %v1806_v8  ;;  %v1827_v31 = vmax.f32 %v649_v61, %v650_v58 }
  0x8c   :  { %v1168_v4 = vpop.eup %1167  ;;  %1187 = vpow2.f32 %v451_v43  ;;  %v468_v6 = vsel %vm2286_vm0, %v1166_v52, 0.0  ;;  %v1830_v33 = vmax.f32 %v658_v41, %v659_v36  ;;  %v1833_v24 = vmax.f32 %v667_v56, %v668_v63 }
  0x8d   :  { %v1170_v19 = vpop.eup %1169  ;;  %1189 = vpow2.f32 %v453_v42  ;;  %v469_v25 = vadd.f32 %v468_v6, %v467_v26  ;;  %v476_v60 = vsel %vm2286_vm0, %v1168_v4, 0.0  ;;  %v1841_v61 = vsel %vm670_vm6, %v1702_v20, 16 }
  0x8e   :  { %v1172_v39 = vpop.eup %1171  ;;  %1191 = vpow2.f32 %v455_v28  ;;  %v477_v23 = vsel %vm2286_vm0, %v1170_v19, 0.0  ;;  %v1849_v36 = vsel %vm671_vm7, %v1707_v0, 16  ;;  %v1855_v18 = vsel %vm672_vm8, %v1702_v20, 16 }
  0x8f   :  { %v1174_v43 = vpop.eup %1173  ;;  %1193 = vpow2.f32 %v457_v27  ;;  %v470_v58 = vrot.slane %v469_v25, 4  ;;  %v478_v41 = vadd.f32 %v477_v23, %v476_v60  ;;  %v485_v42 = vsel %vm2286_vm0, %v1172_v39, 0.0 }
  0x90   :  { %v1176_v28 = vpop.eup %1175  ;;  %1195 = vpow2.f32 %v459_v1  ;;  %v486_v56 = vsel %vm2286_vm0, %v1174_v43, 0.0  ;;  %v1863_v14 = vsel %vm673_vm9, %v1707_v0, 16  ;;  %v1871_v23 = vsel %vm674_vm10, %v1702_v20, 16 }
  0x91   :  { %v1178_v27 = vpop.eup %1177  ;;  %1197 = vpow2.f32 %v461_v54  ;;  %v471_v63 = vadd.f32 %v470_v58, %v469_v25  ;;  %v479_v52 = vrot.slane %v478_v41, 4  ;;  %v487_v26 = vadd.f32 %v486_v56, %v485_v42 }
  0x92   :  { %v1180_v1 = vpop.eup %1179  ;;  %1199 = vpow2.f32 %v463_v3  ;;  %v494_v4 = vsel %vm2286_vm0, %v1176_v28, 0.0  ;;  %v495_v6 = vsel %vm2286_vm0, %v1178_v27, 0.0  ;;  %vm677_vm13 = vcmp.eq.f32.partialorder %v1575_v32, %v1733_v50 }
  0x93   :  { %v1182_v13 = vpop.eup %1181  ;;  %1201 = vpow2.f32 %v465_v7  ;;  %v472_v16 = vrot.slane %v471_v63, 2  ;;  %v480_v19 = vadd.f32 %v479_v52, %v478_v41  ;;  %v488_v54 = vrot.slane %v487_v26, 4 }
  0x94   :  { %v1184_v25 = vpop.eup %1183  ;;  %v496_v60 = vadd.f32 %v495_v6, %v494_v4  ;;  %v503_v39 = vsel %vm2286_vm0, %v1180_v1, 0.0  ;;  %v504_v3 = vsel %vm2286_vm0, %v1182_v13, 0.0  ;;  %v1881_v47 = vsel %vm675_vm11, %v1707_v0, 16 }
  0x95   :  { %v1186_v49 = vpop.eup %1185  ;;  %v473_v21 = vadd.f32 %v472_v16, %v471_v63  ;;  %v481_v43 = vrot.slane %v480_v19, 2  ;;  %v489_v58 = vadd.f32 %v488_v54, %v487_v26  ;;  %v505_v7 = vadd.f32 %v504_v3, %v503_v39 }
  0x96   :  { %v1188_v42 = vpop.eup %1187  ;;  %v497_v41 = vrot.slane %v496_v60, 4  ;;  %v512_v28 = vsel %vm2286_vm0, %v1184_v25, 0.0  ;;  %v513_v56 = vsel %vm2286_vm0, %v1186_v49, 0.0  ;;  %v1889_v51 = vsel %vm676_vm12, %v1702_v20, 16 }
  0x97   :  { %v1190_v27 = vpop.eup %1189  ;;  %v474_v63 = vrot.slane %v473_v21, 1  ;;  %v482_v52 = vadd.f32 %v481_v43, %v480_v19  ;;  %v490_v26 = vrot.slane %v489_v58, 2  ;;  %v506_v1 = vrot.slane %v505_v7, 4 }
  0x98   :  { %v1192_v4 = vpop.eup %1191  ;;  %v498_v6 = vadd.f32 %v497_v41, %v496_v60  ;;  %v514_v13 = vadd.f32 %v513_v56, %v512_v28  ;;  %v521_v16 = vsel %vm2286_vm0, %v1188_v42, 0.0  ;;  %v522_v54 = vsel %vm2286_vm0, %v1190_v27, 0.0  ;;  %v2313_v28 = vld [vmem:[#allocation12_spill] sm:$0xff]  ;;  %v2314_v56 = vld [vmem:[#allocation13_spill] sm:$0xff] }
  0x99   :  { %v1194_v25 = vpop.eup %1193  ;;  %v483_v39 = vrot.slane %v482_v52, 1  ;;  %v491_v3 = vadd.f32 %v490_v26, %v489_v58  ;;  %v507_v49 = vadd.f32 %v506_v1, %v505_v7  ;;  %v523_v8 = vadd.f32 %v522_v54, %v521_v16  ;;  %v2315_v54 = vld [vmem:[#allocation14_spill] sm:$0xff] }
  0x9a   :  { %v1196_v62 = vpop.eup %1195  ;;  %v499_v19 = vrot.slane %v498_v6, 2  ;;  %v515_v43 = vrot.slane %v514_v13, 4  ;;  %v530_v60 = vsel %vm2286_vm0, %v1192_v4, 0.0  ;;  %vm678_vm14 = vcmp.eq.f32.partialorder %v1609_v37, %v1738_v2 }
  0x9b   :  { %vm679_vm15 = vcmp.eq.f32.partialorder %v1615_v38, %v1738_v2  ;;  %v1198_v58 = vpop.eup %1197  ;;  %v475_v7 = vadd.f32 %v474_v63, %v473_v21  ;;  %v492_v42 = vrot.slane %v491_v3, 1  ;;  %v508_v41 = vrot.slane %v507_v49, 2 }
  0x9c   :  { %v531_v59 = vsel %vm2286_vm0, %v1194_v25, 0.0  ;;  %vm680_vm1 = vcmp.eq.f32.partialorder %v2313_v28, %v1751_v45  ;;  %vm681_vm2 = vcmp.eq.f32.partialorder %v2314_v56, %v1751_v45  ;;  %v1200_v27 = vpop.eup %1199  ;;  %v500_v26 = vadd.f32 %v499_v19, %v498_v6 }
  0x9d   :  { %v516_v1 = vadd.f32 %v515_v43, %v514_v13  ;;  %v524_v4 = vrot.slane %v523_v8, 4  ;;  %v532_v16 = vadd.f32 %v531_v59, %v530_v60  ;;  %vm682_vm4 = vcmp.eq.f32.partialorder %v2315_v54, %v1812_v40  ;;  %v1202_v46 = vpop.eup %1201  ;;  %v2318_v60 = vld [vmem:[#allocation17_spill] sm:$0xff] }
  0x9e   :  { %v484_v21 = vadd.f32 %v483_v39, %v482_v52  ;;  %v509_v63 = vadd.f32 %v508_v41, %v507_v49  ;;  %v539_v57 = vsel %vm2286_vm0, %v1196_v62, 0.0  ;;  %v540_v25 = vsel %vm2286_vm0, %v1198_v58, 0.0 }
  0x9f   :  { %vm683_vm5 = vcmp.eq.f32.partialorder %v2316_v12, %v1812_v40  ;;  %vm684_vm6 = vcmp.eq.f32.partialorder %v2317_v34, %v1827_v31  ;;  %v501_v6 = vrot.slane %v500_v26, 1  ;;  %v517_v13 = vrot.slane %v516_v1, 2 }
  0xa0   :  { %v525_v19 = vadd.f32 %v524_v4, %v523_v8  ;;  %v533_v43 = vrot.slane %v532_v16, 4  ;;  %vm685_vm7 = vcmp.eq.f32.partialorder %v2318_v60, %v1827_v31  ;;  %v510_v59 = vrot.slane %v509_v63, 1 }
  0xa1   :  { %v541_v52 = vadd.f32 %v540_v25, %v539_v57  ;;  %v548_v39 = vsel %vm2286_vm0, %v1200_v27, 0.0  ;;  %v549_v49 = vsel %vm2286_vm0, %v1202_v46, 0.0  ;;  %v493_v62 = vadd.f32 %v492_v42, %v491_v3  ;;  %v2320_v46 = vld [vmem:[#allocation19_spill] sm:$0xff]  ;;  %v2321_v3 = vld [vmem:[#allocation20_spill] sm:$0xff]  ;;  %v2322_v42 = vld [vmem:[#allocation21_spill] sm:$0xff] }
  0xa2   :  { %v518_v58 = vadd.f32 %v517_v13, %v516_v1  ;;  %v526_v41 = vrot.slane %v525_v19, 2  ;;  %v534_v44 = vadd.f32 %v533_v43, %v532_v16  ;;  %vm686_vm8 = vcmp.eq.f32.partialorder %v2319_v22, %v1830_v33 }
  0xa3   :  { %v502_v55 = vadd.f32 %v501_v6, %v500_v26  ;;  %v542_v53 = vrot.slane %v541_v52, 4  ;;  %v550_v8 = vadd.f32 %v549_v49, %v548_v39  ;;  %v1919_v4 = vsel %vm677_vm13, %v1707_v0, 16 }
  0xa4   :  { %v519_v57 = vrot.slane %v518_v58, 1  ;;  %v527_v27 = vadd.f32 %v526_v41, %v525_v19  ;;  %v535_v25 = vrot.slane %v534_v44, 2  ;;  %1203 = vlog2.f32 %v475_v7 }
  0xa5   :  { %vm687_vm9 = vcmp.eq.f32.partialorder %v2320_v46, %v1830_v33  ;;  %vm688_vm10 = vcmp.eq.f32.partialorder %v2321_v3, %v1833_v24  ;;  %vm689_vm11 = vcmp.eq.f32.partialorder %v2322_v42, %v1833_v24  ;;  %v511_v26 = vadd.f32 %v510_v59, %v509_v63 }
  0xa6   :  { %v543_v1 = vadd.f32 %v542_v53, %v541_v52  ;;  %v551_v16 = vrot.slane %v550_v8, 4  ;;  %1205 = vlog2.f32 %v484_v21  ;;  %v520_v32 = vadd.f32 %v519_v57, %v518_v58 }
  0xa7   :  { %v528_v50 = vrot.slane %v527_v27, 1  ;;  %v536_v6 = vadd.f32 %v535_v25, %v534_v44  ;;  %1207 = vlog2.f32 %v493_v62  ;;  %v1931_v7 = vsel %vm678_vm14, %v1702_v20, 16 }
  0xa8   :  { %v544_v13 = vrot.slane %v543_v1, 2  ;;  %v552_v19 = vadd.f32 %v551_v16, %v550_v8  ;;  %v1937_v63 = vsel %vm679_vm15, %v1707_v0, 16  ;;  %1209 = vlog2.f32 %v502_v55 }
  0xa9   :  { %v537_v53 = vrot.slane %v536_v6, 1  ;;  %v1943_v44 = vsel %vm680_vm1, %v1702_v20, 16  ;;  %v1949_v37 = vsel %vm681_vm2, %v1707_v0, 16  ;;  %1211 = vlog2.f32 %v511_v26 }
  0xaa   :  { %v545_v21 = vadd.f32 %v544_v13, %v543_v1  ;;  %v553_v43 = vrot.slane %v552_v19, 2  ;;  %v1955_v38 = vsel %vm682_vm4, %v1702_v20, 16  ;;  %v529_v2 = vadd.f32 %v528_v50, %v527_v27 }
  0xab   :  { %1213 = vlog2.f32 %v520_v32  ;;  %v1961_v55 = vsel %vm683_vm5, %v1707_v0, 16  ;;  %v1967_v45 = vsel %vm684_vm6, %v1702_v20, 16  ;;  %v1973_v54 = vsel %vm685_vm7, %v1707_v0, 16 }
  0xac   :  { %v546_v28 = vrot.slane %v545_v21, 1  ;;  %v554_v56 = vadd.f32 %v553_v43, %v552_v19  ;;  %v710_v59 = vsel %vm2286_vm0, %v1841_v61, 2147483647  ;;  %v538_v12 = vadd.f32 %v537_v53, %v536_v6 }
  0xad   :  { %v711_v40 = vsel %vm2286_vm0, %v1849_v36, 2147483647  ;;  %v723_v34 = vsel %vm2286_vm0, %v1855_v18, 2147483647  ;;  %v724_v52 = vsel %vm2286_vm0, %v1863_v14, 2147483647  ;;  %1215 = vlog2.f32 %v529_v2 }
  0xae   :  { %v555_v39 = vrot.slane %v554_v56, 1  ;;  %v1987_v31 = vsel %vm686_vm8, %v1702_v20, 16  ;;  %vm712_vm12 = vcmp.lt.s32.totalorder %v710_v59, %v711_v40  ;;  %vm725_vm13 = vcmp.lt.s32.totalorder %v723_v34, %v724_v52  ;;  %v1204_v61 = vpop.eup %1203 }
  0xaf   :  { %v713_v60 = vsel %vm712_vm12, %v710_v59, %v711_v40  ;;  %v726_v49 = vsel %vm725_vm13, %v723_v34, %v724_v52  ;;  %v736_v36 = vsel %vm2286_vm0, %v1871_v23, 2147483647  ;;  %v1995_v14 = vsel %vm687_vm9, %v1707_v0, 16 }
  0xb0   :  { %v1206_v18 = vpop.eup %1205  ;;  %v2001_v22 = vsel %vm688_vm10, %v1702_v20, 16  ;;  %v2007_v62 = vsel %vm689_vm11, %v1707_v0, 16  ;;  %v714_v23 = vrot.slane %v713_v60, 4  ;;  %v547_v41 = vadd.f32 %v546_v28, %v545_v21 }
  0xb1   :  { %v1208_v58 = vpop.eup %1207  ;;  %1217 = vlog2.f32 %v538_v12  ;;  %v727_v8 = vrot.slane %v726_v49, 4  ;;  %v737_v33 = vsel %vm2286_vm0, %v1881_v47, 2147483647  ;;  %v556_v57 = vadd.f32 %v555_v39, %v554_v56 }
  0xb2   :  { %v2011_v27 = vmul.f32 0.6931472, %v1204_v61  ;;  %vm715_vm14 = vcmp.lt.s32.totalorder %v713_v60, %v714_v23  ;;  %vm738_vm15 = vcmp.lt.s32.totalorder %v736_v36, %v737_v33  ;;  %v1210_v25 = vpop.eup %1209  ;;  %v2013_v46 = vmul.f32 0.6931472, %v1206_v18 }
  0xb3   :  { %v716_v3 = vsel %vm715_vm14, %v713_v60, %v714_v23  ;;  %vm728_vm1 = vcmp.lt.s32.totalorder %v726_v49, %v727_v8  ;;  %v739_v24 = vsel %vm738_vm15, %v736_v36, %v737_v33  ;;  %v1212_v42 = vpop.eup %1211  ;;  %v2015_v26 = vmul.f32 0.6931472, %v1208_v58 }
  0xb4   :  { %v717_v1 = vrot.slane %v716_v3, 2  ;;  %v729_v16 = vsel %vm728_vm1, %v726_v49, %v727_v8  ;;  %v740_v32 = vrot.slane %v739_v24, 4  ;;  %1219 = vlog2.f32 %v547_v41 }
  0xb5   :  { %v1214_v50 = vpop.eup %1213  ;;  %v730_v47 = vrot.slane %v729_v16, 2  ;;  %v749_v6 = vsel %vm2286_vm0, %v1889_v51, 2147483647  ;;  %v750_v13 = vsel %vm2286_vm0, %v1919_v4, 2147483647  ;;  %1221 = vlog2.f32 %v556_v57 }
  0xb6   :  { %v2021_v19 = vmul.f32 0.6931472, %v1210_v25  ;;  %vm718_vm2 = vcmp.lt.s32.totalorder %v716_v3, %v717_v1  ;;  %vm741_vm4 = vcmp.lt.s32.totalorder %v739_v24, %v740_v32  ;;  %vm751_vm5 = vcmp.lt.s32.totalorder %v749_v6, %v750_v13 }
  0xb7   :  { %v719_v53 = vsel %vm718_vm2, %v716_v3, %v717_v1  ;;  %vm731_vm6 = vcmp.lt.s32.totalorder %v729_v16, %v730_v47  ;;  %v742_v21 = vsel %vm741_vm4, %v739_v24, %v740_v32  ;;  %v752_v43 = vsel %vm751_vm5, %v749_v6, %v750_v13  ;;  %v2023_v59 = vpop.eup %1215 }
  0xb8   :  { %v720_v2 = vrot.slane %v719_v53, 1  ;;  %v732_v28 = vsel %vm731_vm6, %v729_v16, %v730_v47  ;;  %v743_v56 = vrot.slane %v742_v21, 2  ;;  %v753_v51 = vrot.slane %v752_v43, 4 }
  0xb9   :  { %v733_v12 = vrot.slane %v732_v28, 1  ;;  %v762_v4 = vsel %vm2286_vm0, %v1931_v7, 2147483647  ;;  %v763_v40 = vsel %vm2286_vm0, %v1937_v63, 2147483647 }
  0xba   :  { %v2029_v34 = vmul.f32 0.6931472, %v1212_v42  ;;  %vm721_vm7 = vcmp.lt.s32.totalorder %v719_v53, %v720_v2  ;;  %vm744_vm8 = vcmp.lt.s32.totalorder %v742_v21, %v743_v56  ;;  %vm764_vm9 = vcmp.lt.s32.totalorder %v762_v4, %v763_v40 }
  0xbb   :  { %v2031_v52 = vpop.eup %1217  ;;  %v2033_v39 = vmul.f32 0.6931472, %v1214_v50  ;;  %vm734_vm10 = vcmp.lt.s32.totalorder %v732_v28, %v733_v12  ;;  %v745_v61 = vsel %vm744_vm8, %v742_v21, %v743_v56  ;;  %v775_v60 = vsel %vm2286_vm0, %v1943_v44, 2147483647 }
  0xbc   :  { %v2037_v49 = vsel %vm721_vm7, %v719_v53, %v720_v2  ;;  %v746_v7 = vrot.slane %v745_v61, 1  ;;  %vm754_vm11 = vcmp.lt.s32.totalorder %v752_v43, %v753_v51  ;;  %v765_v36 = vsel %vm764_vm9, %v762_v4, %v763_v40 }
  0xbd   :  { %v2039_v63 = vsel %vm734_vm10, %v732_v28, %v733_v12  ;;  %v755_v18 = vsel %vm754_vm11, %v752_v43, %v753_v51  ;;  %v766_v23 = vrot.slane %v765_v36, 4  ;;  %v776_v58 = vsel %vm2286_vm0, %v1949_v37, 2147483647 }
  0xbe   :  { %vm747_vm12 = vcmp.lt.s32.totalorder %v745_v61, %v746_v7  ;;  %v756_v41 = vrot.slane %v755_v18, 2  ;;  %vm777_vm13 = vcmp.lt.s32.totalorder %v775_v60, %v776_v58  ;;  %v788_v8 = vsel %vm2286_vm0, %v1955_v38, 2147483647  ;;  %v2045_v33 = vpop.eup %1219 }
  0xbf   :  { %v2047_v44 = vsel %vm747_vm12, %v745_v61, %v746_v7  ;;  %vm767_vm14 = vcmp.lt.s32.totalorder %v765_v36, %v766_v23  ;;  %v778_v57 = vsel %vm777_vm13, %v775_v60, %v776_v58  ;;  %v789_v25 = vsel %vm2286_vm0, %v1961_v55, 2147483647  ;;  %v2053_v38 = vpop.eup %1221 }
  0xc0   :  { %vm757_vm15 = vcmp.lt.s32.totalorder %v755_v18, %v756_v41  ;;  %v768_v3 = vsel %vm767_vm14, %v765_v36, %v766_v23  ;;  %v779_v24 = vrot.slane %v778_v57, 4  ;;  %vm790_vm1 = vcmp.lt.s32.totalorder %v788_v8, %v789_v25 }
  0xc1   :  { %v758_v37 = vsel %vm757_vm15, %v755_v18, %v756_v41  ;;  %v769_v42 = vrot.slane %v768_v3, 2  ;;  %v791_v1 = vsel %vm790_vm1, %v788_v8, %v789_v25  ;;  %v801_v16 = vsel %vm2286_vm0, %v1967_v45, 2147483647 }
  0xc2   :  { %v759_v32 = vrot.slane %v758_v37, 1  ;;  %vm780_vm2 = vcmp.lt.s32.totalorder %v778_v57, %v779_v24  ;;  %v792_v50 = vrot.slane %v791_v1, 4  ;;  %v802_v47 = vsel %vm2286_vm0, %v1973_v54, 2147483647 }
  0xc3   :  { %vm770_vm4 = vcmp.lt.s32.totalorder %v768_v3, %v769_v42  ;;  %v781_v55 = vsel %vm780_vm2, %v778_v57, %v779_v24  ;;  %vm803_vm5 = vcmp.lt.s32.totalorder %v801_v16, %v802_v47  ;;  %v814_v6 = vsel %vm2286_vm0, %v1987_v31, 2147483647 }
  0xc4   :  { %vm760_vm6 = vcmp.lt.s32.totalorder %v758_v37, %v759_v32  ;;  %v771_v13 = vsel %vm770_vm4, %v768_v3, %v769_v42  ;;  %v782_v53 = vrot.slane %v781_v55, 2  ;;  %vm793_vm7 = vcmp.lt.s32.totalorder %v791_v1, %v792_v50 }
  0xc5   :  { %v2059_v21 = vsel %vm760_vm6, %v758_v37, %v759_v32  ;;  %v772_v45 = vrot.slane %v771_v13, 1  ;;  %v794_v43 = vsel %vm793_vm7, %v791_v1, %v792_v50  ;;  %v804_v2 = vsel %vm803_vm5, %v801_v16, %v802_v47 }
  0xc6   :  { %vm783_vm8 = vcmp.lt.s32.totalorder %v781_v55, %v782_v53  ;;  %v795_v28 = vrot.slane %v794_v43, 2  ;;  %v805_v56 = vrot.slane %v804_v2, 4  ;;  %v815_v54 = vsel %vm2286_vm0, %v1995_v14, 2147483647 }
  0xc7   :  { %vm773_vm9 = vcmp.lt.s32.totalorder %v771_v13, %v772_v45  ;;  %v784_v12 = vsel %vm783_vm8, %v781_v55, %v782_v53  ;;  %vm816_vm10 = vcmp.lt.s32.totalorder %v814_v6, %v815_v54  ;;  %v827_v31 = vsel %vm2286_vm0, %v2001_v22, 2147483647  ;;  %v2327_v53 = vld [vmem:[#allocation24_spill] sm:$0xff] }
  0xc8   :  { %v2065_v51 = vsel %vm773_vm9, %v771_v13, %v772_v45  ;;  %v785_v4 = vrot.slane %v784_v12, 1  ;;  %vm796_vm11 = vcmp.lt.s32.totalorder %v794_v43, %v795_v28  ;;  %vm806_vm12 = vcmp.lt.s32.totalorder %v804_v2, %v805_v56  ;;  %v2329_v45 = vld [vmem:[#allocation26_spill] sm:$0xff] }
  0xc9   :  { %v797_v40 = vsel %vm796_vm11, %v794_v43, %v795_v28  ;;  %v807_v61 = vsel %vm806_vm12, %v804_v2, %v805_v56  ;;  %v817_v60 = vsel %vm816_vm10, %v814_v6, %v815_v54  ;;  %v828_v7 = vsel %vm2286_vm0, %v2007_v62, 2147483647  ;;  %v2330_v2 = vld [vmem:[#allocation27_spill] sm:$0xff]  ;;  %v2332_v56 = vld [vmem:[#allocation28_spill] sm:$0xff] }
  0xca   :  { %vm786_vm13 = vcmp.lt.s32.totalorder %v784_v12, %v785_v4  ;;  %v798_v36 = vrot.slane %v797_v40, 1  ;;  %v808_v14 = vrot.slane %v807_v61, 2  ;;  %v818_v18 = vrot.slane %v817_v60, 4 }
  0xcb   :  { %v787_v23 = vsel %vm786_vm13, %v784_v12, %v785_v4  ;;  %vm829_vm14 = vcmp.lt.s32.totalorder %v827_v31, %v828_v7  ;;  %vm840_vm15 = vcmp.eq.s32.totalorder %v1702_v20, %v2037_v49  ;;  %vm841_vm1 = vcmp.eq.s32.totalorder %v1707_v0, %v2037_v49  ;;  %v2333_v12 = vld [vmem:[#allocation29_spill] sm:$0xff] }
  0xcc   :  { %vm799_vm2 = vcmp.lt.s32.totalorder %v797_v40, %v798_v36  ;;  %vm809_vm4 = vcmp.lt.s32.totalorder %v807_v61, %v808_v14  ;;  %vm819_vm5 = vcmp.lt.s32.totalorder %v817_v60, %v818_v18  ;;  %v830_v22 = vsel %vm829_vm14, %v827_v31, %v828_v7 }
  0xcd   :  { %v800_v58 = vsel %vm799_vm2, %v797_v40, %v798_v36  ;;  %v810_v41 = vsel %vm809_vm4, %v807_v61, %v808_v14  ;;  %v820_v8 = vsel %vm819_vm5, %v817_v60, %v818_v18  ;;  %v831_v62 = vrot.slane %v830_v22, 4  ;;  %v2335_v40 = vld [vmem:[#allocation31_spill] sm:$0xff] }
  0xce   :  { %v811_v57 = vrot.slane %v810_v41, 1  ;;  %v821_v25 = vrot.slane %v820_v8, 2  ;;  %vm842_vm6 = vcmp.eq.s32.totalorder %v1702_v20, %v2039_v63  ;;  %vm843_vm7 = vcmp.eq.s32.totalorder %v1707_v0, %v2039_v63 }
  0xcf   :  { %vm832_vm8 = vcmp.lt.s32.totalorder %v830_v22, %v831_v62  ;;  %vm844_vm9 = vcmp.eq.s32.totalorder %v1702_v20, %v2047_v44  ;;  %vm845_vm10 = vcmp.eq.s32.totalorder %v1707_v0, %v2047_v44  ;;  %vm848_vm2 = vcmp.eq.s32.totalorder %v1702_v20, %v2065_v51  ;;  %v2325_v44 = vld [vmem:[#allocation22_spill] sm:$0xff] }
  0xd0   :  { %vm812_vm12 = vcmp.lt.s32.totalorder %v810_v41, %v811_v57  ;;  %vm822_vm13 = vcmp.lt.s32.totalorder %v820_v8, %v821_v25  ;;  %v833_v3 = vsel %vm832_vm8, %v830_v22, %v831_v62  ;;  %vm849_vm4 = vcmp.eq.s32.totalorder %v1707_v0, %v2065_v51  ;;  %v2334_v51 = vld [vmem:[#allocation30_spill] sm:$0xff] }
  0xd1   :  { %v813_v24 = vsel %vm812_vm12, %v810_v41, %v811_v57  ;;  %v823_v37 = vsel %vm822_vm13, %v820_v8, %v821_v25  ;;  %v834_v42 = vrot.slane %v833_v3, 2  ;;  %vm850_vm5 = vcmp.eq.s32.totalorder %v1702_v20, %v787_v23 }
  0xd2   :  { %v824_v1 = vrot.slane %v823_v37, 1  ;;  %vm851_vm3 = vcmp.eq.s32.totalorder %v1707_v0, %v787_v23  ;;  %vm852_vm8 = vcmp.eq.s32.totalorder %v1702_v20, %v800_v58  ;;  %vm853_vm11 = vcmp.eq.s32.totalorder %v1707_v0, %v800_v58 }
  0xd3   :  { %vm835_vm0 = vcmp.lt.s32.totalorder %v833_v3, %v834_v42  ;;  %vm854_vm12 = vcmp.eq.s32.totalorder %v1702_v20, %v813_v24  ;;  %v860_v32 = vsel %vm840_vm15, %v1711_v9, 0.0  ;;  %v861_v55 = vsel %vm841_vm1, %v1714_v10, 0.0 }
  0xd4   :  { %vm825_vm13 = vcmp.lt.s32.totalorder %v823_v37, %v824_v1  ;;  %v836_v16 = vsel %vm835_vm0, %v833_v3, %v834_v42  ;;  %v862_v6 = vsel %vm842_vm6, %v1718_v15, 0.0  ;;  %v863_v9 = vsel %vm843_vm7, %v1723_v5, 0.0 }
  0xd5   :  { %v826_v50 = vsel %vm825_vm13, %v823_v37, %v824_v1  ;;  %v837_v47 = vrot.slane %v836_v16, 1  ;;  %v864_v49 = vsel %vm844_vm9, %v1729_v29, 0.0  ;;  %v865_v10 = vsel %vm845_vm10, %v1736_v35, 0.0 }
  0xd6   :  { %vm856_vm0 = vcmp.eq.s32.totalorder %v1702_v20, %v826_v50  ;;  %vm857_vm14 = vcmp.eq.s32.totalorder %v1707_v0, %v826_v50  ;;  %vm2323_vm1 = vcmp.eq.s32.totalorder %v1702_v20, %v2059_v21  ;;  %vm2324_vm6 = vcmp.eq.s32.totalorder %v1707_v0, %v2059_v21  ;;  %v2328_v21 = vld [vmem:[#allocation25_spill] sm:$0xff] }
  0xd7   :  { %vm838_vm15 = vcmp.lt.s32.totalorder %v836_v16, %v837_v47  ;;  %v866_v15 = vsel %vm2323_vm1, %v1742_v30, 0.0  ;;  %v867_v5 = vsel %vm2324_vm6, %v1748_v48, 0.0  ;;  %v868_v29 = vsel %vm848_vm2, %v1755_v11, 0.0  ;;  %v2326_v48 = vld [vmem:[#allocation23_spill] sm:$0xff] }
  0xd8   :  { %v839_v63 = vsel %vm838_vm15, %v836_v16, %v837_v47  ;;  %v869_v35 = vsel %vm849_vm4, %v1759_v17, 0.0  ;;  %v870_v30 = vsel %vm850_vm5, %v2325_v44, 0.0  ;;  %v871_v13 = vsel %vm851_vm3, %v2326_v48, 0.0 }
  0xd9   :  { %vm858_vm7 = vcmp.eq.s32.totalorder %v1702_v20, %v839_v63  ;;  %vm859_vm9 = vcmp.eq.s32.totalorder %v1707_v0, %v839_v63  ;;  %v872_v11 = vsel %vm852_vm8, %v2327_v53, 0.0  ;;  %v873_v17 = vsel %vm853_vm11, %v2328_v21, 0.0 }
  0xda   :  { %v874_v43 = vsel %vm854_vm12, %v2329_v45, 0.0  ;;  %vm2331_vm10 = vcmp.eq.s32.totalorder %v1707_v0, %v813_v24  ;;  %v2160_v54 = vsel %vm856_vm0, %v2332_v56, 0.0  ;;  %v2165_v31 = vsel %vm857_vm14, %v2333_v12, 0.0 }
  0xdb   :  { %v875_v28 = vsel %vm2331_vm10, %v2330_v2, 0.0  ;;  %v2168_v4 = vsel %vm858_vm7, %v2334_v51, 0.0  ;;  %v2171_v61 = vsel %vm859_vm9, %v2335_v40, 0.0  ;;  %vm2336_vm3 = vcmask 261120  }
  0xdc   :  { %v880_v60 = vsel %vm2336_vm3, %v860_v32, 0.0  ;;  %vm2337_vm11 = vmmov %vm2336_vm3 }
  0xdd   :  { %v881_v7 = vsel %vm2337_vm11, %v861_v55, 0.0  ;;  %vm2338_vm2 = vmmov %vm2336_vm3 }
  0xde   :  { %v889_v36 = vsel %vm2338_vm2, %v862_v6, 0.0  ;;  %vm2339_vm4 = vmmov %vm2338_vm2  ;;  %v882_v18 = vadd.f32 %v881_v7, %v880_v60 }
  0xdf   :  { %v890_v20 = vsel %vm2339_vm4, %v863_v9, 0.0  ;;  %vm2340_vm5 = vmmov %vm2338_vm2 }
  0xe0   :  { %v898_v14 = vsel %vm2340_vm5, %v864_v49, 0.0  ;;  %v891_v0 = vadd.f32 %v890_v20, %v889_v36  ;;  %vm2341_vm14 = vmmov %vm2338_vm2  ;;  %v883_v57 = vrot.slane %v882_v18, 4  ;;  %vm990_vm5 = vcmask 253952  }
  0xe1   :  { %v899_v23 = vsel %vm2341_vm14, %v865_v10, 0.0  ;;  %vm2342_vm8 = vmmov %vm2338_vm2 }
  0xe2   :  { %v907_v22 = vsel %vm2342_vm8, %v866_v15, 0.0  ;;  %v900_v58 = vadd.f32 %v899_v23, %v898_v14  ;;  %vm2343_vm12 = vmmov %vm2338_vm2  ;;  %v892_v25 = vrot.slane %v891_v0, 4  ;;  %v884_v32 = vadd.f32 %v883_v57, %v882_v18 }
  0xe3   :  { %v908_v41 = vsel %vm2343_vm12, %v867_v5, 0.0  ;;  %vm2344_vm13 = vmmov %vm2338_vm2 }
  0xe4   :  { %v916_v8 = vsel %vm2344_vm13, %v868_v29, 0.0  ;;  %vm2345_vm0 = vmmov %vm2338_vm2  ;;  %v909_v3 = vadd.f32 %v908_v41, %v907_v22  ;;  %v901_v37 = vrot.slane %v900_v58, 4  ;;  %v893_v50 = vadd.f32 %v892_v25, %v891_v0 }
  0xe5   :  { %v917_v62 = vsel %vm2345_vm0, %v869_v35, 0.0  ;;  %vm2346_vm15 = vmmov %vm2345_vm0  ;;  %v885_v15 = vrot.slane %v884_v32, 2 }
  0xe6   :  { %v918_v24 = vadd.f32 %v917_v62, %v916_v8  ;;  %v925_v42 = vsel %vm2346_vm15, %v870_v30, 0.0  ;;  %vm2347_vm1 = vmmov %vm2345_vm0  ;;  %v910_v47 = vrot.slane %v909_v3, 4  ;;  %v902_v6 = vadd.f32 %v901_v37, %v900_v58 }
  0xe7   :  { %v926_v1 = vsel %vm2347_vm1, %v871_v13, 0.0  ;;  %vm2348_vm6 = vmmov %vm2345_vm0  ;;  %v894_v5 = vrot.slane %v893_v50, 2  ;;  %v886_v13 = vadd.f32 %v885_v15, %v884_v32 }
  0xe8   :  { %v934_v16 = vsel %vm2348_vm6, %v872_v11, 0.0  ;;  %v919_v55 = vrot.slane %v918_v24, 4  ;;  %v927_v9 = vadd.f32 %v926_v1, %v925_v42  ;;  %vm2349_vm7 = vmmov %vm2345_vm0  ;;  %v911_v63 = vadd.f32 %v910_v47, %v909_v3 }
  0xe9   :  { %v935_v49 = vsel %vm2349_vm7, %v873_v17, 0.0  ;;  %vm2350_vm9 = vmmov %vm2345_vm0  ;;  %v903_v35 = vrot.slane %v902_v6, 2  ;;  %v895_v53 = vadd.f32 %v894_v5, %v893_v50  ;;  %v887_v17 = vrot.slane %v886_v13, 1 }
  0xea   :  { %v943_v10 = vsel %vm2350_vm9, %v874_v43, 0.0  ;;  %v920_v29 = vadd.f32 %v919_v55, %v918_v24  ;;  %v928_v44 = vrot.slane %v927_v9, 4  ;;  %v936_v30 = vadd.f32 %v935_v49, %v934_v16  ;;  %vm2351_vm10 = vmmov %vm2345_vm0 }
  0xeb   :  { %v944_v48 = vsel %vm2351_vm10, %v875_v28, 0.0  ;;  %v912_v11 = vrot.slane %v911_v63, 2  ;;  %v904_v45 = vadd.f32 %v903_v35, %v902_v6  ;;  %v896_v51 = vrot.slane %v895_v53, 1  ;;  %vm2352_vm3 = vmmov %vm2345_vm0 }
  0xec   :  { %v921_v21 = vrot.slane %v920_v29, 2  ;;  %v929_v2 = vadd.f32 %v928_v44, %v927_v9  ;;  %v937_v56 = vrot.slane %v936_v30, 4  ;;  %v945_v12 = vadd.f32 %v944_v48, %v943_v10  ;;  %vm2353_vm11 = vmmov %vm2345_vm0  ;;  %v227_v10 = vpop.xlane.xlu0 %226 }
  0xed   :  { %v913_v43 = vadd.f32 %v912_v11, %v911_v63  ;;  %v905_v60 = vrot.slane %v904_v45, 1  ;;  %v888_v14 = vadd.f32 %v887_v17, %v886_v13  ;;  %v897_v18 = vadd.f32 %v896_v51, %v895_v53  ;;  %vm2354_vm2 = vmmov %vm2345_vm0 }
  0xee   :  { %v922_v40 = vadd.f32 %v921_v21, %v920_v29  ;;  %v930_v7 = vrot.slane %v929_v2, 2  ;;  %v938_v36 = vadd.f32 %v937_v56, %v936_v30  ;;  %v946_v20 = vrot.slane %v945_v12, 4  ;;  %vm2355_vm4 = vmmov %vm2345_vm0 }
  0xef   :  { %v914_v0 = vrot.slane %v913_v43, 1  ;;  %v906_v23 = vadd.f32 %v905_v60, %v904_v45  ;;  %v952_v57 = vsel %vm2352_vm3, %v2160_v54, 0.0  ;;  %v953_v25 = vsel %vm2353_vm11, %v2165_v31, 0.0 }
  0xf0   :  { %v923_v28 = vrot.slane %v922_v40, 1  ;;  %v931_v22 = vadd.f32 %v930_v7, %v929_v2  ;;  %v939_v58 = vrot.slane %v938_v36, 2  ;;  %v947_v41 = vadd.f32 %v946_v20, %v945_v12  ;;  %v213_v56 = vpop.xlane.xlu0 %212 }
  0xf1   :  { %v915_v8 = vadd.f32 %v914_v0, %v913_v43  ;;  %v954_v42 = vadd.f32 %v953_v25, %v952_v57  ;;  %v961_v1 = vsel %vm2354_vm2, %v2168_v4, 0.0  ;;  %v962_v16 = vsel %vm2355_vm4, %v2171_v61, 0.0 }
  0xf2   :  { %v924_v62 = vadd.f32 %v923_v28, %v922_v40  ;;  %v932_v3 = vrot.slane %v931_v22, 1  ;;  %v940_v24 = vadd.f32 %v939_v58, %v938_v36  ;;  %v948_v37 = vrot.slane %v947_v41, 2 }
  0xf3   :  { %v970_v32 = vsub.f32 %v2011_v27, %v888_v14  ;;  %v971_v50 = vsub.f32 %v2013_v46, %v897_v18  ;;  %v955_v6 = vrot.slane %v954_v42, 4  ;;  %v963_v9 = vadd.f32 %v962_v16, %v961_v1  ;;  %v2356_v46 = vld [vmem:[#allocation11_spill] sm:$0xff] }
  0xf4   :  { %v933_v47 = vadd.f32 %v932_v3, %v931_v22  ;;  %v941_v55 = vrot.slane %v940_v24, 1  ;;  %v949_v54 = vadd.f32 %v948_v37, %v947_v41  ;;  %v972_v31 = vsub.f32 %v2015_v26, %v906_v23 }
  0xf5   :  { %v973_v49 = vsub.f32 %v2021_v19, %v915_v8  ;;  %v570_v4 = vmul.f32 0.6931472, %v2023_v59  ;;  %v956_v61 = vadd.f32 %v955_v6, %v954_v42  ;;  %v964_v63 = vrot.slane %v963_v9, 4 }
  0xf6   :  { %v942_v15 = vadd.f32 %v941_v55, %v940_v24  ;;  %v950_v5 = vrot.slane %v949_v54, 1  ;;  %v974_v27 = vsub.f32 %v2029_v34, %v924_v62  ;;  %vm2357_vm14 = vcmp.lt.s32.totalorder %v2356_v46, 32 }
  0xf7   :  { %v980_v29 = vsel %vm2357_vm14, %v970_v32, 0.0  ;;  %vm2358_vm8 = vmmov %vm2357_vm14  ;;  %v572_v26 = vmul.f32 0.6931472, %v2031_v52  ;;  %v957_v44 = vrot.slane %v956_v61, 2  ;;  %v975_v19 = vsub.f32 %v2033_v39, %v933_v47  ;;  %v245_v32 = vpop.xlane.xlu1 %244 }
  0xf8   :  { %v981_v35 = vsel %vm2358_vm8, %v971_v50, 0.0  ;;  %vm2359_vm12 = vmmov %vm2358_vm8  ;;  %v951_v30 = vadd.f32 %v950_v5, %v949_v54  ;;  %v965_v48 = vadd.f32 %v964_v63, %v963_v9  ;;  %v991_v34 = vsel %vm990_vm5, %v980_v29, 0.0 }
  0xf9   :  { %v982_v59 = vsel %vm2359_vm12, %v972_v31, 0.0  ;;  %vm2360_vm13 = vmmov %vm2358_vm8  ;;  %v958_v53 = vadd.f32 %v957_v44, %v956_v61  ;;  %v976_v11 = vsub.f32 %v570_v4, %v942_v15  ;;  %v992_v21 = vsel %vm990_vm5, %v981_v35, 0.0 }
  0xfa   :  { %v983_v13 = vsel %vm2360_vm13, %v973_v49, 0.0  ;;  %v966_v45 = vrot.slane %v965_v48, 2  ;;  %vm2361_vm0 = vmmov %vm2358_vm8  ;;  %v993_v2 = vadd.f32 %v992_v21, %v991_v34  ;;  %v994_v39 = vsel %vm990_vm5, %v982_v59, 0.0 }
  0xfb   :  { %v984_v52 = vsel %vm2361_vm0, %v974_v27, 0.0  ;;  %v574_v12 = vmul.f32 0.6931472, %v2045_v33  ;;  %v959_v17 = vrot.slane %v958_v53, 1  ;;  %v996_v51 = vsel %vm990_vm5, %v983_v13, 0.0  ;;  %vm2362_vm15 = vmmov %vm2361_vm0  ;;  %v261_v61 = vpop.xlane.xlu1 %260 }
  0xfc   :  { %v967_v43 = vadd.f32 %v966_v45, %v965_v48  ;;  %v977_v40 = vsub.f32 %v572_v26, %v951_v30  ;;  %v985_v60 = vsel %vm2362_vm15, %v975_v19, 0.0  ;;  %v995_v7 = vadd.f32 %v994_v39, %v993_v2  ;;  %vm2363_vm1 = vmmov %vm2361_vm0 }
  0xfd   :  { %v960_v36 = vadd.f32 %v959_v17, %v958_v53  ;;  %v998_v20 = vsel %vm990_vm5, %v984_v52, 0.0  ;;  %v228_v14 = vrot.slane %v227_v10, 4  ;;  %v214_v18 = vrot.slane %v213_v56, 4  ;;  %vm2364_vm6 = vmmov %vm2361_vm0 }
  0xfe   :  { %v576_v0 = vmul.f32 0.6931472, %v2053_v38  ;;  %v968_v28 = vrot.slane %v967_v43, 1  ;;  %v986_v33 = vsel %vm2363_vm1, %v976_v11, 0.0  ;;  %v997_v23 = vadd.f32 %v996_v51, %v995_v7  ;;  %vm2365_vm7 = vmmov %vm2361_vm0 }
  0xff   :  { %v978_v22 = vsub.f32 %v574_v12, %v960_v36  ;;  %v1000_v58 = vsel %vm990_vm5, %v985_v60, 0.0  ;;  %v229_v41 = vadd.f32 %v228_v14, %v227_v10  ;;  %v215_v8 = vadd.f32 %v214_v18, %v213_v56  ;;  %vm2366_vm9 = vmmov %vm2361_vm0 }
 0x100   :  { %v969_v62 = vadd.f32 %v968_v28, %v967_v43  ;;  %v987_v57 = vsel %vm2364_vm6, %v977_v40, 0.0  ;;  %v999_v25 = vadd.f32 %v998_v20, %v997_v23  ;;  %v1002_v3 = vsel %vm990_vm5, %v986_v33, 0.0 }
 0x101   :  { %v230_v24 = vrot.slane %v229_v41, 2  ;;  %v216_v37 = vrot.slane %v215_v8, 2  ;;  %v988_v42 = vsel %vm2365_vm7, %v978_v22, 0.0  ;;  %v1004_v16 = vsel %vm990_vm5, %v987_v57, 0.0 }
 0x102   :  { %v979_v38 = vsub.f32 %v576_v0, %v969_v62  ;;  %v1001_v1 = vadd.f32 %v1000_v58, %v999_v25  ;;  %v1006_v6 = vsel %vm990_vm5, %v988_v42, 0.0  ;;  %v246_v27 = vrot.slane %v245_v32, 4 }
 0x103   :  { %v217_v50 = vadd.f32 %v216_v37, %v215_v8  ;;  %v231_v47 = vadd.f32 %v230_v24, %v229_v41  ;;  %v262_v29 = vrot.slane %v261_v61, 4 }
 0x104   :  { %v989_v55 = vsel %vm2366_vm9, %v979_v38, 0.0  ;;  %v1003_v54 = vadd.f32 %v1002_v3, %v1001_v1  ;;  %v247_v46 = vadd.f32 %v246_v27, %v245_v32 }
 0x105   :  { %v218_v9 = vrot.slane %v217_v50, 1  ;;  %v232_v31 = vrot.slane %v231_v47, 1  ;;  %v1008_v10 = vsel %vm990_vm5, %v989_v55, 0.0  ;;  %v263_v35 = vadd.f32 %v262_v29, %v261_v61 }
 0x106   :  { %v1005_v49 = vadd.f32 %v1004_v16, %v1003_v54  ;;  %v248_v26 = vrot.slane %v247_v46, 2 }
 0x107   :  { %v219_v4 = vadd.f32 %v218_v9, %v217_v50  ;;  %v233_v15 = vadd.f32 %v232_v31, %v231_v47  ;;  %v264_v44 = vrot.slane %v263_v35, 2 }
 0x108   :  { %v1007_v5 = vadd.f32 %v1006_v6, %v1005_v49  ;;  %v249_v19 = vadd.f32 %v248_v26, %v247_v46 }
 0x109   :  { %1062 = vpush %v219_v4  ;;  %v265_v59 = vadd.f32 %v264_v44, %v263_v35 }
 0x10a   :  { %v1009_v63 = vadd.f32 %v1008_v10, %v1007_v5  ;;  %1064 = vpush %v233_v15  ;;  %v250_v30 = vrot.slane %v249_v19, 1 }
 0x10b   :  { %v266_v13 = vrot.slane %v265_v59, 1 }
 0x10c   :  { %1010 = vadd.xlane.f32.xlu0 %v1009_v63  ;;  %v251_v48 = vadd.f32 %v250_v30, %v249_v19 }
 0x10d   :  { %v267_v34 = vadd.f32 %v266_v13, %v265_v59 }
 0x10e   :  { %1066 = vpush %v251_v48 }
 0x10f   :  { %1068 = vpush %v267_v34 }
 0x13a   :  { %s1063_s1 = spop %1062 }
 0x13b   :  { %1020 = sst [smem:[#allocation7]] %s1063_s1  ;;  %s1065_s6 = spop %1064 }
 0x13c   :  { %1022 = sst [smem:[#allocation7 + $0x1]] %s1065_s6 }
 0x13f   :  { %s1067_s7 = spop %1066 }
 0x140   :  { %1024 = sst [smem:[#allocation7 + $0x2]] %s1067_s7  ;;  %s1069_s8 = spop %1068 }
 0x141   :  { %1026 = sst [smem:[#allocation7 + $0x3]] %s1069_s8 }
 0x199   :  { %v1011_v53 = vpop.xlane.xlu0 %1010 }
 0x19a   :  { %v1012_v11 = vrot.slane %v1011_v53, 4 }
 0x19c   :  { %v1013_v21 = vadd.f32 %v1012_v11, %v1011_v53 }
 0x19e   :  { %v1014_v45 = vrot.slane %v1013_v21, 2 }
 0x1a0   :  { %v1015_v52 = vadd.f32 %v1014_v45, %v1013_v21 }
 0x1a2   :  { %v1016_v2 = vrot.slane %v1015_v52, 1 }
 0x1a4   :  { %v1017_v39 = vadd.f32 %v1016_v2, %v1015_v52 }
 0x1a6   :  { %1070 = vpush %v1017_v39 }
 0x1d7   :  { %s1071_s10 = spop %1070 }
 0x1d8   :  { %1028 = sst [smem:[#allocation7 + $0x4]] %s1071_s10 }
 0x1d9   :  { %1276 = shalt.err (!%p1273_p4)
}
 0x1da   :  { %s1289_s18 = smov [#allocation7]  }
 0x1db   :  { %1042 = dma.smem_to_hbm %s1289_s18, 16, %s2251_s2, [#allocation4]  }
 0x1dc   :  { %1281 = dma.done.wait [#allocation4], 16  }
 0x1dd   :  { %1282 = vsyncadd [#allocation4], 4294967280 }
 0x1de   :  { %1046 = sfence }
 0x1df   :  { %1047 = vsyncpa [#allocation3], 1 }
 0x1e0   :  { %1048 = vsyncpa [#allocation6], 1 }
 0x1e1   :  { %1049 = vsyncpa [#allocation4], 1 }

</bundles_post_ra>
